<compile_context>
chip_gen: v7x
topology: tpu7x:2x2x1
jax: 0.10.0
libtpu: 0.0.40
codegen_flags: <defaults>
</compile_context>

<pallas_src>
import jax
import jax.numpy as jnp
from jax.experimental import pallas as pl
from jax.experimental.pallas import tpu as pltpu

# ---- model hyper-parameters (consistent with the module's config) ----
FIELD_NUM = 9          # fixed in the module
FIELD_SIZE = 16        # config 'hidden_size'
DEEP_LAYER1 = 64       # config 'deep_layer1'
DEEP_LAYER2 = 32       # config 'deep_layer2'
BN_EPS = 1e-5

D_IN = FIELD_NUM * FIELD_SIZE                 # 144
AUG_N = DEEP_LAYER1 + FIELD_SIZE + 2          # 82 = [h1 | field-sum | y_first@wf1]


def deepfm_kernel(x_ref, w1aug_ref, b1_ref, ssum_ref, w2_ref, b2_ref,
                  wf2t_ref, wf3t_ref, bf_ref, out_ref):
    # bf16 over HBM, f32 math in-kernel.
    x = x_ref[...].astype(jnp.float32)                                      # (TB, 144)

    # One wide MXU dot covering: deep layer-1 (BN folded), the per-field sum needed
    # by the FM second-order term, and the y_first @ wf1 column of the final logits.
    aug = jnp.dot(x, w1aug_ref[...], preferred_element_type=jnp.float32)    # (TB, 82)
    h1 = jnp.maximum(aug[:, :DEEP_LAYER1] + b1_ref[...], 0.0)               # (TB, 64)
    summed = aug[:, DEEP_LAYER1:DEEP_LAYER1 + FIELD_SIZE]                   # (TB, 16)
    first_logits = aug[:, DEEP_LAYER1 + FIELD_SIZE:]                        # (TB, 2)

    # FM second-order term: per-field sum of squares via a tiny MXU dot on x*x.
    squared_sum = jnp.dot(x * x, ssum_ref[...],
                          preferred_element_type=jnp.float32)               # (TB, 16)
    y_second = 0.5 * (summed * summed - squared_sum)                        # (TB, 16)

    # Deep layer-2 (BN folded; Dropout == identity in eval).
    h2 = jnp.maximum(
        jnp.dot(h1, w2_ref[...], preferred_element_type=jnp.float32) + b2_ref[...],
        0.0)                                                                # (TB, 32)

    # Remaining final-projection columns on the VPU (16- and 32-lane reduces only;
    # the 144-lane x-column was folded into the MXU dot above).
    def col(c):                                      # c is a static Python int
        acc = jnp.sum(y_second * wf2t_ref[c:c + 1, :], axis=1, keepdims=True)
        acc = acc + jnp.sum(h2 * wf3t_ref[c:c + 1, :], axis=1, keepdims=True)
        return acc                                   # (TB, 1)

    out = first_logits + jnp.concatenate([col(0), col(1)], axis=1) + bf_ref[...]
    out_ref[...] = out.astype(out_ref.dtype)


def _round_up(n, m):
    return ((n + m - 1) // m) * m


def _choose_tile(batch, block_b):
    """Batch tile: multiple of 16 (bf16 sublane packing), as large as block_b allows,
    but capped so the grid keeps >= 2 steps (v7x dual-TensorCore sharding)."""
    tb = min(block_b, _round_up(batch, 16))
    tb = max(16, (tb // 16) * 16)
    if batch >= 32:
        tb = min(tb, _round_up(pl.cdiv(batch, 2), 16))
    return tb


def deepfm_forward(emb, params, *, block_b=1024, input_buffers=None):
    """emb: (B, FIELD_NUM, FIELD_SIZE) float32 -> logits (B, 2) float32."""
    B = emb.shape[0]
    # bf16 input stream (halves the dominant HBM read); all math stays f32 in-kernel.
    x = emb.reshape(B, D_IN).astype(jnp.bfloat16)

    # ---- one-time host-side parameter prep ----
    # Fold eval-mode BatchNorm into the Linear weights.
    w1f = params['w1'] * params['s1']
    b1f = params['b1'] * params['s1'] + params['t1']
    w2f = params['w2'] * params['s2']
    b2f = params['b2'] * params['s2'] + params['t2']
    # Augmented first-layer weights: [w1 (BN-folded) | per-field segment-sum | wf1 fold].
    seg_sum = jnp.tile(jnp.eye(FIELD_SIZE, dtype=jnp.float32), (FIELD_NUM, 1))  # (144,16)
    w_first = jnp.repeat(params['wf1'], FIELD_SIZE, axis=0)                     # (144, 2)
    w1aug = jnp.concatenate([w1f, seg_sum, w_first], axis=1)                    # (144, 82)
    # Transpose the remaining final weights so the kernel sublane-broadcasts a row.
    wf2t = params['wf2'].T                                                      # (2, 16)
    wf3t = params['wf3'].T                                                      # (2, 32)
    bf = params['bf']                                                           # (1, 2)

    # ---- batch tiling ----
    tb = _choose_tile(B, block_b)
    grid = pl.cdiv(B, tb)
    bp = grid * tb
    if bp != B:
        x = jnp.pad(x, ((0, bp - B), (0, 0)))

    def make_batch_spec():
        if input_buffers is not None:
            # Optional deeper input pipelining (review: sweep Buffered(2) vs (3)).
            try:
                return pl.BlockSpec((tb, D_IN), lambda i: (i, 0),
                                    pipeline_mode=pl.Buffered(input_buffers))
            except TypeError:
                pass
        return pl.BlockSpec((tb, D_IN), lambda i: (i, 0))

    batch_spec = make_batch_spec()

    def resident(shape):                  # weights: DMA'd once, stay VMEM-resident
        return pl.BlockSpec(shape, lambda i: (0, 0))

    out = pl.pallas_call(
        deepfm_kernel,
        out_shape=jax.ShapeDtypeStruct((bp, 2), jnp.float32),
        grid=(grid,),
        in_specs=[batch_spec,
                  resident((D_IN, AUG_N)), resident((1, DEEP_LAYER1)),
                  resident((D_IN, FIELD_SIZE)),
                  resident((DEEP_LAYER1, DEEP_LAYER2)), resident((1, DEEP_LAYER2)),
                  resident((2, FIELD_SIZE)), resident((2, DEEP_LAYER2)),
                  resident((1, 2))],
        out_specs=pl.BlockSpec((tb, 2), lambda i: (i, 0)),
        compiler_params=pltpu.CompilerParams(
            dimension_semantics=("parallel",),
            vmem_limit_bytes=32 * 1024 * 1024),
    )(x, w1aug, b1f, seg_sum, w2f, b2f, wf2t, wf3t, bf)
    return out[:B]


def init_params(key):
    """Deterministic parameter init (PyTorch-style uniform Linear, default BN)."""
    ks = jax.random.split(key, 3)

    def linear(k, fan_in, fan_out):
        bound = 1.0 / jnp.sqrt(fan_in)
        kw, kb = jax.random.split(k)
        w = jax.random.uniform(kw, (fan_in, fan_out), jnp.float32, -bound, bound)
        b = jax.random.uniform(kb, (1, fan_out), jnp.float32, -bound, bound)
        return w, b

    w1, b1 = linear(ks[0], D_IN, DEEP_LAYER1)
    w2, b2 = linear(ks[1], DEEP_LAYER1, DEEP_LAYER2)

    final_in = FIELD_SIZE + FIELD_NUM + DEEP_LAYER2
    wf_full, bf = linear(ks[2], final_in, 2)
    # torch.cat order is [y_first_order (9), y_second_order (16), y_deep (32)]
    wf1 = wf_full[:FIELD_NUM]                                  # (9, 2)
    wf2 = wf_full[FIELD_NUM:FIELD_NUM + FIELD_SIZE]            # (16, 2)
    wf3 = wf_full[FIELD_NUM + FIELD_SIZE:]                     # (32, 2)

    # BatchNorm1d defaults (eval): gamma=1, beta=0, running_mean=0, running_var=1.
    def bn_fold(dim):
        gamma = jnp.ones((1, dim), jnp.float32)
        beta = jnp.zeros((1, dim), jnp.float32)
        mean = jnp.zeros((1, dim), jnp.float32)
        var = jnp.ones((1, dim), jnp.float32)
        scale = gamma / jnp.sqrt(var + BN_EPS)
        shift = beta - mean * scale
        return scale, shift

    s1, t1 = bn_fold(DEEP_LAYER1)
    s2, t2 = bn_fold(DEEP_LAYER2)

    return dict(w1=w1, b1=b1, s1=s1, t1=t1,
                w2=w2, b2=b2, s2=s2, t2=t2,
                wf1=wf1, wf2=wf2, wf3=wf3, bf=bf)


def deepfm_reference(emb, params):
    """Pure-JAX reference of the module's forward pass (for verification)."""
    B = emb.shape[0]
    y_first = jnp.sum(emb, axis=2)
    summed = jnp.sum(emb, axis=1)
    y_second = 0.5 * (summed * summed - jnp.sum(emb * emb, axis=1))
    x = emb.reshape(B, D_IN)
    h1 = jnp.maximum((x @ params['w1'] + params['b1']) * params['s1'] + params['t1'], 0.0)
    h2 = jnp.maximum((h1 @ params['w2'] + params['b2']) * params['s2'] + params['t2'], 0.0)
    cat = jnp.concatenate([y_first, y_second, h2], axis=1)
    wf = jnp.concatenate([params['wf1'], params['wf2'], params['wf3']], axis=0)
    return cat @ wf + params['bf']


if __name__ == "__main__":
    key = jax.random.PRNGKey(0)
    k_emb, k_par = jax.random.split(key)

    # Synthetic FieldEncoder(user, music) output: (B, field_num, field_size)
    BATCH = 256
    emb = jax.random.normal(k_emb, (BATCH, FIELD_NUM, FIELD_SIZE), jnp.float32)
    params = init_params(k_par)

    logits = jax.block_until_ready(deepfm_forward(emb, params))
    assert logits.shape == (BATCH, 2)

    # Tight check: same f32 math applied to the bf16-rounded embedding the kernel reads.
    emb_q = emb.astype(jnp.bfloat16).astype(jnp.float32)
    ref_q = deepfm_reference(emb_q, params)
    assert jnp.allclose(logits, ref_q, rtol=1e-3, atol=1e-3), "mismatch vs quantized-input reference"

    # Loose check vs the full-f32 module semantics (difference = bf16 input rounding only).
    ref = deepfm_reference(emb, params)
    assert jnp.allclose(logits, ref, rtol=0.0, atol=0.5), "drift vs f32 reference too large"

    print("KERNEL_OK")
</pallas_src>

<mosaic_0001>
module attributes {stable_mosaic.version = 11 : i64} {
  func.func @deepfm_kernel(%arg0: i32, %arg1: memref<128x144xbf16, #tpu.memory_space<vmem>>, %arg2: memref<144x82xf32, #tpu.memory_space<vmem>>, %arg3: memref<1x64xf32, #tpu.memory_space<vmem>>, %arg4: memref<144x16xf32, #tpu.memory_space<vmem>>, %arg5: memref<64x32xf32, #tpu.memory_space<vmem>>, %arg6: memref<1x32xf32, #tpu.memory_space<vmem>>, %arg7: memref<2x16xf32, #tpu.memory_space<vmem>>, %arg8: memref<2x32xf32, #tpu.memory_space<vmem>>, %arg9: memref<1x2xf32, #tpu.memory_space<vmem>>, %arg10: memref<128x2xf32, #tpu.memory_space<vmem>>) attributes {dimension_semantics = [#tpu.dimension_semantics<parallel>], iteration_bounds = array<i64: 2>, scalar_prefetch = 0 : i64, scratch_operands = 0 : i64, tpu.core_type = #tpu.core_type<tc>, window_params = [{transform_indices = @transform_0, window_bounds = array<i64: 128, 144>}, {pipeline_mode = #tpu.pipeline_mode<synchronous>, transform_indices = @transform_1, window_bounds = array<i64: 144, 82>}, {pipeline_mode = #tpu.pipeline_mode<synchronous>, transform_indices = @transform_2, window_bounds = array<i64: 1, 64>}, {pipeline_mode = #tpu.pipeline_mode<synchronous>, transform_indices = @transform_3, window_bounds = array<i64: 144, 16>}, {pipeline_mode = #tpu.pipeline_mode<synchronous>, transform_indices = @transform_4, window_bounds = array<i64: 64, 32>}, {pipeline_mode = #tpu.pipeline_mode<synchronous>, transform_indices = @transform_5, window_bounds = array<i64: 1, 32>}, {pipeline_mode = #tpu.pipeline_mode<synchronous>, transform_indices = @transform_6, window_bounds = array<i64: 2, 16>}, {pipeline_mode = #tpu.pipeline_mode<synchronous>, transform_indices = @transform_7, window_bounds = array<i64: 2, 32>}, {pipeline_mode = #tpu.pipeline_mode<synchronous>, transform_indices = @transform_8, window_bounds = array<i64: 1, 2>}, {transform_indices = @transform_9, window_bounds = array<i64: 128, 2>}]} {
    %c0 = arith.constant 0 : index
    %c0_0 = arith.constant 0 : index
    %0 = vector.load %arg1[%c0, %c0_0] : memref<128x144xbf16, #tpu.memory_space<vmem>>, vector<128x144xbf16>
    %1 = arith.extf %0 : vector<128x144xbf16> to vector<128x144xf32>
    %c0_1 = arith.constant 0 : index
    %c0_2 = arith.constant 0 : index
    %2 = vector.load %arg2[%c0_1, %c0_2] : memref<144x82xf32, #tpu.memory_space<vmem>>, vector<144x82xf32>
    %cst = arith.constant dense<0.000000e+00> : vector<128x82xf32>
    %3 = tpu.matmul %1, %2, %cst {dimension_numbers = #tpu.dot_dimension_numbers<[1], [0], [0], [1], [0, 0, 1, 1], [], []>} : vector<128x144xf32>, vector<144x82xf32>, vector<128x82xf32> -> vector<128x82xf32>
    %4 = vector.extract_strided_slice %3 {offsets = [0, 0], sizes = [128, 64], strides = [1, 1]} : vector<128x82xf32> to vector<128x64xf32>
    %c0_3 = arith.constant 0 : index
    %c0_4 = arith.constant 0 : index
    %5 = vector.load %arg3[%c0_3, %c0_4] : memref<1x64xf32, #tpu.memory_space<vmem>>, vector<1x64xf32>
    %6 = vector.broadcast %5 : vector<1x64xf32> to vector<128x64xf32>
    %7 = arith.addf %4, %6 : vector<128x64xf32>
    %cst_5 = arith.constant 0.000000e+00 : f32
    %8 = vector.broadcast %cst_5 : f32 to vector<128x64xf32>
    %9 = arith.maximumf %7, %8 : vector<128x64xf32>
    %10 = vector.extract_strided_slice %3 {offsets = [0, 64], sizes = [128, 16], strides = [1, 1]} : vector<128x82xf32> to vector<128x16xf32>
    %11 = vector.extract_strided_slice %3 {offsets = [0, 80], sizes = [128, 2], strides = [1, 1]} : vector<128x82xf32> to vector<128x2xf32>
    %12 = arith.mulf %1, %1 : vector<128x144xf32>
    %c0_6 = arith.constant 0 : index
    %c0_7 = arith.constant 0 : index
    %13 = vector.load %arg4[%c0_6, %c0_7] : memref<144x16xf32, #tpu.memory_space<vmem>>, vector<144x16xf32>
    %cst_8 = arith.constant dense<0.000000e+00> : vector<128x16xf32>
    %14 = tpu.matmul %12, %13, %cst_8 {dimension_numbers = #tpu.dot_dimension_numbers<[1], [0], [0], [1], [0, 0, 1, 1], [], []>} : vector<128x144xf32>, vector<144x16xf32>, vector<128x16xf32> -> vector<128x16xf32>
    %15 = arith.mulf %10, %10 : vector<128x16xf32>
    %16 = arith.subf %15, %14 : vector<128x16xf32>
    %cst_9 = arith.constant 5.000000e-01 : f32
    %17 = vector.broadcast %cst_9 : f32 to vector<128x16xf32>
    %18 = arith.mulf %17, %16 : vector<128x16xf32>
    %c0_10 = arith.constant 0 : index
    %c0_11 = arith.constant 0 : index
    %19 = vector.load %arg5[%c0_10, %c0_11] : memref<64x32xf32, #tpu.memory_space<vmem>>, vector<64x32xf32>
    %cst_12 = arith.constant dense<0.000000e+00> : vector<128x32xf32>
    %20 = tpu.matmul %9, %19, %cst_12 {dimension_numbers = #tpu.dot_dimension_numbers<[1], [0], [0], [1], [0, 0, 1, 1], [], []>} : vector<128x64xf32>, vector<64x32xf32>, vector<128x32xf32> -> vector<128x32xf32>
    %c0_13 = arith.constant 0 : index
    %c0_14 = arith.constant 0 : index
    %21 = vector.load %arg6[%c0_13, %c0_14] : memref<1x32xf32, #tpu.memory_space<vmem>>, vector<1x32xf32>
    %22 = vector.broadcast %21 : vector<1x32xf32> to vector<128x32xf32>
    %23 = arith.addf %20, %22 : vector<128x32xf32>
    %cst_15 = arith.constant 0.000000e+00 : f32
    %24 = vector.broadcast %cst_15 : f32 to vector<128x32xf32>
    %25 = arith.maximumf %23, %24 : vector<128x32xf32>
    %c0_16 = arith.constant 0 : index
    %c0_17 = arith.constant 0 : index
    %26 = vector.load %arg7[%c0_16, %c0_17] : memref<2x16xf32, #tpu.memory_space<vmem>>, vector<1x16xf32>
    %27 = vector.broadcast %26 : vector<1x16xf32> to vector<128x16xf32>
    %28 = arith.mulf %18, %27 : vector<128x16xf32>
    %cst_18 = arith.constant dense<0.000000e+00> : vector<128xf32>
    %29 = vector.multi_reduction <add>, %28, %cst_18 [1] : vector<128x16xf32> to vector<128xf32>
    %30 = vector.shape_cast %29 : vector<128xf32> to vector<128x1xf32>
    %c0_19 = arith.constant 0 : index
    %c0_20 = arith.constant 0 : index
    %31 = vector.load %arg8[%c0_19, %c0_20] : memref<2x32xf32, #tpu.memory_space<vmem>>, vector<1x32xf32>
    %32 = vector.broadcast %31 : vector<1x32xf32> to vector<128x32xf32>
    %33 = arith.mulf %25, %32 : vector<128x32xf32>
    %cst_21 = arith.constant dense<0.000000e+00> : vector<128xf32>
    %34 = vector.multi_reduction <add>, %33, %cst_21 [1] : vector<128x32xf32> to vector<128xf32>
    %35 = vector.shape_cast %34 : vector<128xf32> to vector<128x1xf32>
    %36 = arith.addf %30, %35 : vector<128x1xf32>
    %c1 = arith.constant 1 : index
    %c0_22 = arith.constant 0 : index
    %37 = vector.load %arg7[%c1, %c0_22] : memref<2x16xf32, #tpu.memory_space<vmem>>, vector<1x16xf32>
    %38 = vector.broadcast %37 : vector<1x16xf32> to vector<128x16xf32>
    %39 = arith.mulf %18, %38 : vector<128x16xf32>
    %cst_23 = arith.constant dense<0.000000e+00> : vector<128xf32>
    %40 = vector.multi_reduction <add>, %39, %cst_23 [1] : vector<128x16xf32> to vector<128xf32>
    %41 = vector.shape_cast %40 : vector<128xf32> to vector<128x1xf32>
    %c1_24 = arith.constant 1 : index
    %c0_25 = arith.constant 0 : index
    %42 = vector.load %arg8[%c1_24, %c0_25] : memref<2x32xf32, #tpu.memory_space<vmem>>, vector<1x32xf32>
    %43 = vector.broadcast %42 : vector<1x32xf32> to vector<128x32xf32>
    %44 = arith.mulf %25, %43 : vector<128x32xf32>
    %cst_26 = arith.constant dense<0.000000e+00> : vector<128xf32>
    %45 = vector.multi_reduction <add>, %44, %cst_26 [1] : vector<128x32xf32> to vector<128xf32>
    %46 = vector.shape_cast %45 : vector<128xf32> to vector<128x1xf32>
    %47 = arith.addf %41, %46 : vector<128x1xf32>
    %48 = tpu.concatenate %36, %47 in 1 : vector<128x1xf32>, vector<128x1xf32> -> vector<128x2xf32>
    %49 = arith.addf %11, %48 : vector<128x2xf32>
    %c0_27 = arith.constant 0 : index
    %c0_28 = arith.constant 0 : index
    %50 = vector.load %arg9[%c0_27, %c0_28] : memref<1x2xf32, #tpu.memory_space<vmem>>, vector<1x2xf32>
    %51 = vector.broadcast %50 : vector<1x2xf32> to vector<128x2xf32>
    %52 = arith.addf %49, %51 : vector<128x2xf32>
    %c0_29 = arith.constant 0 : index
    %c0_30 = arith.constant 0 : index
    %53 = vector.load %arg10[%c0_29, %c0_30] : memref<128x2xf32, #tpu.memory_space<vmem>>, vector<128x2xf32>
    tpu.vector_store %arg10[%c0_29, %c0_30], %52 {strides = array<i32>} : memref<128x2xf32, #tpu.memory_space<vmem>>, vector<128x2xf32>,
    return
  }
  func.func @transform_0(%arg0: i32) -> (i32, i32) {
    %c0_i32 = arith.constant 0 : i32
    %c0_i32_0 = arith.constant 0 : i32
    return %arg0, %c0_i32 : i32, i32
  }
  func.func @transform_1(%arg0: i32) -> (i32, i32) {
    %c0_i32 = arith.constant 0 : i32
    %c0_i32_0 = arith.constant 0 : i32
    %c0_i32_1 = arith.constant 0 : i32
    return %c0_i32, %c0_i32_0 : i32, i32
  }
  func.func @transform_2(%arg0: i32) -> (i32, i32) {
    %c0_i32 = arith.constant 0 : i32
    %c0_i32_0 = arith.constant 0 : i32
    %c0_i32_1 = arith.constant 0 : i32
    return %c0_i32, %c0_i32_0 : i32, i32
  }
  func.func @transform_3(%arg0: i32) -> (i32, i32) {
    %c0_i32 = arith.constant 0 : i32
    %c0_i32_0 = arith.constant 0 : i32
    %c0_i32_1 = arith.constant 0 : i32
    return %c0_i32, %c0_i32_0 : i32, i32
  }
  func.func @transform_4(%arg0: i32) -> (i32, i32) {
    %c0_i32 = arith.constant 0 : i32
    %c0_i32_0 = arith.constant 0 : i32
    %c0_i32_1 = arith.constant 0 : i32
    return %c0_i32, %c0_i32_0 : i32, i32
  }
  func.func @transform_5(%arg0: i32) -> (i32, i32) {
    %c0_i32 = arith.constant 0 : i32
    %c0_i32_0 = arith.constant 0 : i32
    %c0_i32_1 = arith.constant 0 : i32
    return %c0_i32, %c0_i32_0 : i32, i32
  }
  func.func @transform_6(%arg0: i32) -> (i32, i32) {
    %c0_i32 = arith.constant 0 : i32
    %c0_i32_0 = arith.constant 0 : i32
    %c0_i32_1 = arith.constant 0 : i32
    return %c0_i32, %c0_i32_0 : i32, i32
  }
  func.func @transform_7(%arg0: i32) -> (i32, i32) {
    %c0_i32 = arith.constant 0 : i32
    %c0_i32_0 = arith.constant 0 : i32
    %c0_i32_1 = arith.constant 0 : i32
    return %c0_i32, %c0_i32_0 : i32, i32
  }
  func.func @transform_8(%arg0: i32) -> (i32, i32) {
    %c0_i32 = arith.constant 0 : i32
    %c0_i32_0 = arith.constant 0 : i32
    %c0_i32_1 = arith.constant 0 : i32
    return %c0_i32, %c0_i32_0 : i32, i32
  }
  func.func @transform_9(%arg0: i32) -> (i32, i32) {
    %c0_i32 = arith.constant 0 : i32
    %c0_i32_0 = arith.constant 0 : i32
    return %arg0, %c0_i32 : i32, i32
  }
}

</mosaic_0001>

<bundles_post_ra>
// kernel: tpu_custom_call.1
= control target key start
LH: loop header
LB: loop body
LE: loop exit
PB: predicated region body
PF: predicated region fallthrough
CT: control target
= control target key end

     0   :  { %s2206_s30 = smov 0   ;;  %s2902_s0 = inlined_call_operand.vmem [shape: bf16[256,144], index: 0, kind: input, shape index: {}]   ;;  %s2903_s1 = inlined_call_operand.vmem [shape: f32[144,82], index: 1, kind: input, shape index: {}]   ;;  %s2904_s2 = inlined_call_operand.vmem [shape: f32[1,64], index: 2, kind: input, shape index: {}]   ;;  %s2905_s3 = inlined_call_operand.vmem [shape: f32[144,16], index: 3, kind: input, shape index: {}]   ;;  %s2906_s4 = inlined_call_operand.vmem [shape: f32[64,32], index: 4, kind: input, shape index: {}]   ;;  %s2907_s5 = inlined_call_operand.vmem [shape: f32[1,32], index: 5, kind: input, shape index: {}]   ;;  %s2908_s6 = inlined_call_operand.vmem [shape: f32[2,16], index: 6, kind: input, shape index: {}]   ;;  %s2909_s7 = inlined_call_operand.vmem [shape: f32[2,32], index: 7, kind: input, shape index: {}]   ;;  %s2910_s8 = inlined_call_operand.vmem [shape: f32[1,2], index: 8, kind: input, shape index: {}]   ;;  %s2911_s9 = inlined_call_operand.vmem [shape: f32[256,2], index: 9, kind: output, shape index: {}]  }
   0x1 LB: > { %s1922_s10 = sadd.s32 4294967295, %s2150_s30   ;;  %p1926_p0 = scmp.ge.s32.totalorder %s2150_s30, 1  ;;  %s2150_s30 = sphi %s2206_s30, %s19_s30  }
   0x2   : > { %p289_p1 = scmp.lt.s32.totalorder %s2150_s30, 3 }
   0x4   : > { %p290_p2 = pnand %p1926_p0, %p289_p1 }
   0x5   : > { %v387_v0 = vld [vmem:[%s2903_s1] sm:$0xff] (!%p290_p2)  ;;  %v388_v1 = vld [vmem:[%s2903_s1 + $0x8] sm:$0xff] (!%p290_p2)  ;;  %s1927_s17 = sshll.u32 (!%p290_p2), %s1922_s10, 4  ;;  %v2152_v3 = vmov (!%p290_p2), 0.0|0.0   ;;  %v389_v6 = vld [vmem:[%s2903_s1 + $0x10] sm:$0xff] (!%p290_p2)  ;;  %vm405_vm0 = vcmask (!%p290_p2), 130048  }
   0x6   : > { %293 = sbr.rel (%p290_p2) target bundleno = 1013 (0x3f5), region = 56  ;;  %v670_v2 = vld [vmem:[%s2905_s3] sm:$0xff] (!%p290_p2)  ;;  %2054 = vmatprep.subr.bf16.mxu0 (!%p290_p2), %v2152_v3  ;;  %2081 = vmatprep.subr.bf16.mxu1 (!%p290_p2), %v2152_v3  ;;  %v2055_v4 = vpack.c.bf16 (!%p290_p2), %v388_v1, %v387_v0  ;;  %v671_v5 = vld [vmem:[%s2905_s3 + $0x8] sm:$0xff] (!%p290_p2)  ;;  %v390_v7 = vld [vmem:[%s2903_s1 + $0x18] sm:$0xff] (!%p290_p2)  ;;  %p327_p3 = scmp.lt.s32.totalorder (!%p290_p2), %s1927_s17, 31  ;;  %vm1008_vm1 = vcmask (!%p290_p2), 523264  }
   0x7   : > { %v2082_v8 = vpack.c.bf16 (!%p290_p2), %v671_v5, %v670_v2  ;;  %v672_v9 = vld [vmem:[%s2905_s3 + $0x10] sm:$0xff] (!%p290_p2)  ;;  %v673_v10 = vld [vmem:[%s2905_s3 + $0x18] sm:$0xff] (!%p290_p2)  ;;  %v2058_v11 = vpack.c.bf16 (!%p290_p2), %v390_v7, %v389_v6  ;;  %v391_v13 = vld [vmem:[%s2903_s1 + $0x20] sm:$0xff] (!%p290_p2)  ;;  %s2153_s20 = smov (!%p290_p2), 64   ;;  %vm1376_vm2 = vcmask (!%p290_p2), 261120   ;;  %vm1663_vm3 = vcmask (!%p290_p2), 7168  }
   0x8   : > { %2056 = vmatpush1.bf16.msra.mxu0 (!%p290_p2), %v2055_v4  ;;  %v2085_v12 = vpack.c.bf16 (!%p290_p2), %v673_v10, %v672_v9  ;;  %v392_v14 = vld [vmem:[%s2903_s1 + $0x28] sm:$0xff] (!%p290_p2)  ;;  %v674_v15 = vld [vmem:[%s2905_s3 + $0x20] sm:$0xff] (!%p290_p2)  ;;  %v393_v19 = vld [vmem:[%s2903_s1 + $0x30] sm:$0xff] (!%p290_p2)  ;;  %s2154_s10 = smov (!%p290_p2), 80   ;;  %s2155_s13 = smov (!%p290_p2), 48   ;;  %vm1849_vm4 = vcmask (!%p290_p2), 15360  }
   0x9   : > { %2083 = vmatpush1.bf16.msra.mxu1 (!%p290_p2), %v2082_v8  ;;  %2057 = vmatprep.subr.bf16.mxu0 (!%p290_p2), %v2152_v3  ;;  %v675_v16 = vld [vmem:[%s2905_s3 + $0x28] sm:$0xff] (!%p290_p2)  ;;  %v2061_v17 = vpack.c.bf16 (!%p290_p2), %v392_v14, %v391_v13  ;;  %v394_v20 = vld [vmem:[%s2903_s1 + $0x38] sm:$0xff] (!%p290_p2)  ;;  %v676_v21 = vld [vmem:[%s2905_s3 + $0x30] sm:$0xff] (!%p290_p2) }
   0xa   : > { %2084 = vmatprep.subr.bf16.mxu1 (!%p290_p2), %v2152_v3  ;;  %v2088_v18 = vpack.c.bf16 (!%p290_p2), %v675_v16, %v674_v15  ;;  %v677_v22 = vld [vmem:[%s2905_s3 + $0x38] sm:$0xff] (!%p290_p2)  ;;  %v2064_v23 = vpack.c.bf16 (!%p290_p2), %v394_v20, %v393_v19  ;;  %v395_v25 = vld [vmem:[%s2903_s1 + $0x40] sm:$0xff] (!%p290_p2)  ;;  %v396_v26 = vld [vmem:[%s2903_s1 + $0x48] sm:$0xff] (!%p290_p2) }
   0xb   : > { %v2091_v24 = vpack.c.bf16 (!%p290_p2), %v677_v22, %v676_v21  ;;  %v678_v28 = vld [vmem:[%s2905_s3 + $0x40] sm:$0xff] (!%p290_p2)  ;;  %v679_v29 = vld [vmem:[%s2905_s3 + $0x48] sm:$0xff] (!%p290_p2)  ;;  %v2067_v31 = vpack.c.bf16 (!%p290_p2), %v396_v26, %v395_v25  ;;  %v397_v34 = vld [vmem:[%s2903_s1 + $0x50] sm:$0xff] (!%p290_p2) }
   0xc   : > { %2059 = vmatpush1.bf16.msra.mxu0 (!%p290_p2), %v2058_v11  ;;  %v2094_v33 = vpack.c.bf16 (!%p290_p2), %v679_v29, %v678_v28  ;;  %v398_v35 = vld [vmem:[%s2903_s1 + $0x58] sm:$0xff] (!%p290_p2)  ;;  %v680_v36 = vld [vmem:[%s2905_s3 + $0x50] sm:$0xff] (!%p290_p2)  ;;  %v399_v40 = vld [vmem:[%s2903_s1 + $0x60] sm:$0xff] (!%p290_p2) }
   0xd   : > { %s2913_s17 = smov (!%p327_p3, %s1927_s17), 31  ;;  %2086 = vmatpush1.bf16.msra.mxu1 %v2085_v12  ;;  %2060 = vmatprep.subr.bf16.mxu0 %v2152_v3  ;;  %v681_v37 = vld [vmem:[%s2905_s3 + $0x58] sm:$0xff]  ;;  %v2070_v38 = vpack.c.bf16 %v398_v35, %v397_v34  ;;  %v400_v41 = vld [vmem:[%s2903_s1 + $0x68] sm:$0xff]  ;;  %v1982_v42 = vld [vmem:[%s2908_s6] ss:$0 sm:$0xff] }
   0xe   : > { %s1989_s16 = sshll.u32 %s2913_s17, 3  ;;  %2087 = vmatprep.subr.bf16.mxu1 %v2152_v3  ;;  %v2097_v39 = vpack.c.bf16 %v681_v37, %v680_v36  ;;  %v682_v43 = vld [vmem:[%s2905_s3 + $0x60] sm:$0xff]  ;;  %v683_v44 = vld [vmem:[%s2905_s3 + $0x68] sm:$0xff]  ;;  %1224 = vrot.lane.b32.xlu0 %v1982_v42, %s2153_s20  ;;  %v2073_v45 = vpack.c.bf16 %v400_v41, %v399_v40  ;;  %v401_v47 = vld [vmem:[%s2903_s1 + $0x70] sm:$0xff] }
   0xf   : > { %s2276_s28 = scalar_lea.vmem %s2902_s0, %s1989_s16  ;;  %v2100_v46 = vpack.c.bf16 %v683_v44, %v682_v43  ;;  %v402_v48 = vld [vmem:[%s2903_s1 + $0x78] sm:$0xff]  ;;  %v684_v49 = vld [vmem:[%s2905_s3 + $0x70] sm:$0xff]  ;;  %v403_v52 = vld [vmem:[%s2903_s1 + $0x80] sm:$0xff]  ;;  %s2865_s18 = scalar_lea.vmem %s2911_s9, %s1989_s16 }
  0x10   : > { %2062 = vmatpush1.bf16.msra.mxu0 %v2061_v17  ;;  %v339_v27 = vld [vmem:[%s2276_s28] sm:$0xff]  ;;  %v685_v50 = vld [vmem:[%s2905_s3 + $0x78] sm:$0xff]  ;;  %v2076_v51 = vpack.c.bf16 %v402_v48, %v401_v47  ;;  %v404_v54 = vld [vmem:[%s2903_s1 + $0x88] sm:$0xff] }
  0x11   : > { %2089 = vmatpush1.bf16.msra.mxu1 %v2088_v18  ;;  %2063 = vmatprep.subr.bf16.mxu0 %v2152_v3  ;;  %v356_v30 = vunpack.c.h.bf16 %v339_v27  ;;  %v2103_v53 = vpack.c.bf16 %v685_v50, %v684_v49  ;;  %v686_v55 = vld [vmem:[%s2905_s3 + $0x80] sm:$0xff]  ;;  %v687_v56 = vld [vmem:[%s2905_s3 + $0x88] sm:$0xff]  ;;  %v2079_v60 = vpack.c.bf16 %v404_v54, %v403_v52  ;;  %v355_v61 = vunpack.c.l.bf16 %v339_v27  ;;  %v341_v1 = vld [vmem:[%s2276_s28 + $0x10] sm:$0xff] }
  0x12   : > { %2090 = vmatprep.subr.bf16.mxu1 %v2152_v3  ;;  %v340_v57 = vld [vmem:[%s2276_s28 + $0x8] sm:$0xff]  ;;  %v993_v58 = vld [vmem:[%s2906_s4] sm:$0xff]  ;;  %v2106_v62 = vpack.c.bf16 %v687_v56, %v686_v55  ;;  %v995_v2 = vld [vmem:[%s2906_s4 + $0x10] sm:$0xff]  ;;  %v360_v8 = vunpack.c.h.bf16 %v341_v1  ;;  %v359_v13 = vunpack.c.l.bf16 %v341_v1 }
  0x13   : > { %1932 = vmatprep.mubr.msk.f32.mxu0 %vm405_vm0, %v356_v30  ;;  %v639_v32 = vmul.f32 %v356_v30, %v356_v30  ;;  %v994_v59 = vld [vmem:[%s2906_s4 + $0x8] sm:$0xff]  ;;  %v358_v63 = vunpack.c.h.bf16 %v340_v57  ;;  %v996_v4 = vld [vmem:[%s2906_s4 + $0x18] sm:$0xff]  ;;  %v638_v5 = vmul.f32 %v355_v61, %v355_v61  ;;  %v357_v6 = vunpack.c.l.bf16 %v340_v57  ;;  %v343_v16 = vld [vmem:[%s2276_s28 + $0x20] sm:$0xff] }
  0x14   : > { %2065 = vmatpush1.bf16.msra.mxu0 %v2064_v23  ;;  %v2108_v0 = vpack.c.bf16 %v994_v59, %v993_v58  ;;  %v342_v9 = vld [vmem:[%s2276_s28 + $0x18] sm:$0xff]  ;;  %v2112_v10 = vpack.c.bf16 %v996_v4, %v995_v2  ;;  %v998_v11 = vld [vmem:[%s2906_s4 + $0x28] sm:$0xff]  ;;  %v643_v14 = vmul.f32 %v360_v8, %v360_v8  ;;  %v999_v18 = vld [vmem:[%s2906_s4 + $0x30] sm:$0xff]  ;;  %v642_v20 = vmul.f32 %v359_v13, %v359_v13 }
  0x15   : > { %2092 = vmatpush1.bf16.msra.mxu1 %v2091_v24  ;;  %2066 = vmatprep.subr.bf16.mxu0 %v2152_v3  ;;  %v641_v7 = vmul.f32 %v358_v63, %v358_v63  ;;  %v640_v12 = vmul.f32 %v357_v6, %v357_v6  ;;  %v362_v15 = vunpack.c.h.bf16 %v342_v9  ;;  %v1000_v19 = vld [vmem:[%s2906_s4 + $0x38] sm:$0xff]  ;;  %v361_v21 = vunpack.c.l.bf16 %v342_v9  ;;  %v344_v24 = vld [vmem:[%s2276_s28 + $0x28] sm:$0xff]  ;;  %v345_v30 = vld [vmem:[%s2276_s28 + $0x30] sm:$0xff] }
  0x16   : > { %2093 = vmatprep.subr.bf16.mxu1 %v2152_v3  ;;  %1949 = vmatprep.mubr.msk.f32.mxu1 %vm405_vm0, %v639_v32  ;;  %v364_v23 = vunpack.c.h.bf16 %v343_v16  ;;  %v2120_v25 = vpack.c.bf16 %v1000_v19, %v999_v18  ;;  %v363_v27 = vunpack.c.l.bf16 %v343_v16  ;;  %v366_v29 = vunpack.c.h.bf16 %v344_v24  ;;  %v346_v35 = vld [vmem:[%s2276_s28 + $0x38] sm:$0xff]  ;;  %v347_v40 = vld [vmem:[%s2276_s28 + $0x40] sm:$0xff]  ;;  %v349_v50 = vld [vmem:[%s2276_s28 + $0x50] sm:$0xff] }
  0x17   : > { %v645_v22 = vmul.f32 %v362_v15, %v362_v15  ;;  %v644_v26 = vmul.f32 %v361_v21, %v361_v21  ;;  %v365_v32 = vunpack.c.l.bf16 %v344_v24  ;;  %v368_v34 = vunpack.c.h.bf16 %v345_v30  ;;  %v350_v55 = vld [vmem:[%s2276_s28 + $0x58] sm:$0xff]  ;;  %v352_v1 = vld [vmem:[%s2276_s28 + $0x68] sm:$0xff] }
  0x18   : > { %2068 = vmatpush1.bf16.msra.mxu0 %v2067_v31  ;;  %v647_v28 = vmul.f32 %v364_v23, %v364_v23  ;;  %v646_v31 = vmul.f32 %v363_v27, %v363_v27  ;;  %v367_v37 = vunpack.c.l.bf16 %v345_v30  ;;  %v369_v42 = vunpack.c.l.bf16 %v346_v35 }
  0x19   : > { %2095 = vmatpush1.bf16.msra.mxu1 %v2094_v33  ;;  %2069 = vmatprep.subr.bf16.mxu0 %v2152_v3  ;;  %v649_v33 = vmul.f32 %v366_v29, %v366_v29  ;;  %v648_v36 = vmul.f32 %v365_v32, %v365_v32  ;;  %v372_v44 = vunpack.c.h.bf16 %v347_v40  ;;  %v371_v47 = vunpack.c.l.bf16 %v347_v40 }
  0x1a   : > { %2096 = vmatprep.subr.bf16.mxu1 %v2152_v3  ;;  %v650_v41 = vmul.f32 %v367_v37, %v367_v37  ;;  %v376_v54 = vunpack.c.h.bf16 %v349_v50  ;;  %v375_v57 = vunpack.c.l.bf16 %v349_v50  ;;  %v378_v59 = vunpack.c.h.bf16 %v350_v55 }
  0x1b   : > { %v655_v48 = vmul.f32 %v372_v44, %v372_v44  ;;  %v381_v9 = vunpack.c.l.bf16 %v352_v1 }
  0x1c   : > { %2071 = vmatpush1.bf16.msra.mxu0 %v2070_v38  ;;  %v651_v38 = vmul.f32 %v368_v34, %v368_v34  ;;  %v659_v58 = vmul.f32 %v376_v54, %v376_v54 }
  0x1d   : > { %2098 = vmatpush1.bf16.msra.mxu1 %v2097_v39  ;;  %2072 = vmatprep.subr.bf16.mxu0 %v2152_v3  ;;  %v370_v39 = vunpack.c.h.bf16 %v346_v35 }
  0x1e   : > { %2099 = vmatprep.subr.bf16.mxu1 %v2152_v3 }
  0x1f   : > { %v653_v43 = vmul.f32 %v370_v39, %v370_v39 }
  0x20   : > { %2074 = vmatpush1.bf16.msra.mxu0 %v2073_v45  ;;  %v348_v45 = vld [vmem:[%s2276_s28 + $0x48] sm:$0xff] }
  0x21   : > { %2101 = vmatpush1.bf16.msra.mxu1 %v2100_v46  ;;  %2075 = vmatprep.subr.bf16.mxu0 %v2152_v3  ;;  %v652_v46 = vmul.f32 %v369_v42, %v369_v42  ;;  %v374_v49 = vunpack.c.h.bf16 %v348_v45  ;;  %v373_v52 = vunpack.c.l.bf16 %v348_v45 }
  0x22   : > { %2102 = vmatprep.subr.bf16.mxu1 %v2152_v3 }
  0x23   : > { %v656_v56 = vmul.f32 %v373_v52, %v373_v52 }
  0x24   : > { %2077 = vmatpush1.bf16.msra.mxu0 %v2076_v51  ;;  %v654_v51 = vmul.f32 %v371_v47, %v371_v47 }
  0x25   : > { %2104 = vmatpush1.bf16.msra.mxu1 %v2103_v53  ;;  %2078 = vmatprep.subr.bf16.mxu0 %v2152_v3  ;;  %v657_v53 = vmul.f32 %v374_v49, %v374_v49 }
  0x26   : > { %2105 = vmatprep.subr.bf16.mxu1 %v2152_v3  ;;  %v997_v3 = vld [vmem:[%s2906_s4 + $0x20] sm:$0xff] }
  0x27   : > { %v2116_v17 = vpack.c.bf16 %v998_v11, %v997_v3  ;;  %v354_v11 = vld [vmem:[%s2276_s28 + $0x78] sm:$0xff] }
  0x28   : > { %2080 = vmatpush1.bf16.msra.mxu0 %v2079_v60  ;;  %v351_v60 = vld [vmem:[%s2276_s28 + $0x60] sm:$0xff] }
  0x29   : > { %2107 = vmatpush1.bf16.msra.mxu1 %v2106_v62  ;;  %2109 = vmatprep.subr.bf16.mxu0 %v2108_v0  ;;  %v377_v62 = vunpack.c.l.bf16 %v350_v55  ;;  %v379_v4 = vunpack.c.l.bf16 %v351_v60 }
  0x2a   : > { %2124 = vmatprep.subr.bf16.mxu1 %v2108_v0 }
  0x2b   : > { %519 = vmatmul.mubr.f32.vlgmr.msra.gmra.mrb[0].mxu0 %v355_v61  ;;  %v658_v61 = vmul.f32 %v375_v57, %v375_v57  ;;  %v660_v2 = vmul.f32 %v377_v62, %v377_v62 }
  0x2c   : > { %801 = vmatmul.mubr.f32.vlgmr.msra.gmra.mrb[0].mxu1 %v638_v5  ;;  %1933 = vmatprep.mubr.msk.f32.mxu0 %vm405_vm0, %v358_v63  ;;  %v661_v63 = vmul.f32 %v378_v59, %v378_v59 }
  0x2d   : > { %1950 = vmatprep.mubr.msk.f32.mxu1 %vm405_vm0, %v641_v7  ;;  %2111 = vmatpush3.bf16.msra.mxu0 %v2108_v0  ;;  %v353_v7 = vld [vmem:[%s2276_s28 + $0x70] sm:$0xff] }
  0x2e   : > { %2113 = vmatprep.subr.bf16.mxu0 %v2112_v10  ;;  %2128 = vmatpush3.bf16.msra.mxu1 %v2108_v0  ;;  %v380_v0 = vunpack.c.h.bf16 %v351_v60  ;;  %v384_v3 = vunpack.c.h.bf16 %v353_v7 }
  0x2f   : > { %524 = vmatmul.mubr.f32.gmra.mrb[2].mxu0 %v357_v6  ;;  %2125 = vmatprep.subr.bf16.mxu1 %v2112_v10  ;;  %v382_v6 = vunpack.c.h.bf16 %v352_v1 }
  0x30   : > { %806 = vmatmul.mubr.f32.gmra.mrb[2].mxu1 %v640_v12  ;;  %1934 = vmatprep.mubr.msk.f32.mxu0 %vm405_vm0, %v360_v8  ;;  %v663_v5 = vmul.f32 %v380_v0, %v380_v0  ;;  %v662_v8 = vmul.f32 %v379_v4, %v379_v4  ;;  %v664_v12 = vmul.f32 %v381_v9, %v381_v9 }
  0x31   : > { %1951 = vmatprep.mubr.msk.f32.mxu1 %vm405_vm0, %v643_v14  ;;  %2115 = vmatpush3.bf16.msra.mxu0 %v2112_v10  ;;  %v667_v14 = vmul.f32 %v384_v3, %v384_v3 }
  0x32   : > { %2117 = vmatprep.subr.bf16.mxu0 %v2116_v17  ;;  %2129 = vmatpush3.bf16.msra.mxu1 %v2112_v10  ;;  %v665_v10 = vmul.f32 %v382_v6, %v382_v6 }
  0x33   : > { %529 = vmatmul.mubr.f32.gmra.mrb[4].mxu0 %v359_v13  ;;  %2126 = vmatprep.subr.bf16.mxu1 %v2116_v17  ;;  %v383_v13 = vunpack.c.l.bf16 %v353_v7 }
  0x34   : > { %811 = vmatmul.mubr.f32.gmra.mrb[4].mxu1 %v642_v20  ;;  %1935 = vmatprep.mubr.msk.f32.mxu0 %vm405_vm0, %v362_v15  ;;  %v386_v15 = vunpack.c.h.bf16 %v354_v11  ;;  %v1984_v20 = vld [vmem:[%s2908_s6 + $0x1] ss:$0 sm:$0xff] }
  0x35   : > { %1952 = vmatprep.mubr.msk.f32.mxu1 %vm405_vm0, %v645_v22  ;;  %2119 = vmatpush3.bf16.msra.mxu0 %v2116_v17  ;;  %v666_v16 = vmul.f32 %v383_v13, %v383_v13 }
  0x36   : > { %2121 = vmatprep.subr.bf16.mxu0 %v2120_v25  ;;  %2130 = vmatpush3.bf16.msra.mxu1 %v2116_v17  ;;  %v385_v17 = vunpack.c.l.bf16 %v354_v11  ;;  %v669_v18 = vmul.f32 %v386_v15, %v386_v15 }
  0x37   : > { %534 = vmatmul.mubr.f32.gmra.mrb[6].mxu0 %v361_v21  ;;  %2127 = vmatprep.subr.bf16.mxu1 %v2120_v25  ;;  %v2433_v21 = vld [vmem:[%s2904_s2] ss:$0 sm:$0xff] }
  0x38   : > { %816 = vmatmul.mubr.f32.gmra.mrb[6].mxu1 %v644_v26  ;;  %1936 = vmatprep.mubr.msk.f32.mxu0 %vm405_vm0, %v364_v23  ;;  %v668_v19 = vmul.f32 %v385_v17, %v385_v17 }
  0x39   : > { %1953 = vmatprep.mubr.msk.f32.mxu1 %vm405_vm0, %v647_v28  ;;  %2123 = vmatpush3.bf16.msra.mxu0 %v2120_v25 }
  0x3a   : > { %2131 = vmatpush3.bf16.msra.mxu1 %v2120_v25  ;;  %1447 = vrot.lane.b32.xlu1 %v1984_v20, %s2153_s20 }
  0x3b   : > { %539 = vmatmul.mubr.f32.gmra.mrb[8].mxu0 %v363_v27 }
  0x3c   : > { %821 = vmatmul.mubr.f32.gmra.mrb[8].mxu1 %v646_v31  ;;  %1937 = vmatprep.mubr.msk.f32.mxu0 %vm405_vm0, %v366_v29 }
  0x3d   : > { %1954 = vmatprep.mubr.msk.f32.mxu1 %vm405_vm0, %v649_v33 }
  0x3f   : > { %544 = vmatmul.mubr.f32.gmra.mrb[10].mxu0 %v365_v32 }
  0x40   : > { %826 = vmatmul.mubr.f32.gmra.mrb[10].mxu1 %v648_v36  ;;  %1938 = vmatprep.mubr.msk.f32.mxu0 %vm405_vm0, %v368_v34 }
  0x41   : > { %1955 = vmatprep.mubr.msk.f32.mxu1 %vm405_vm0, %v651_v38 }
  0x43   : > { %549 = vmatmul.mubr.f32.gmra.mrb[12].mxu0 %v367_v37 }
  0x44   : > { %831 = vmatmul.mubr.f32.gmra.mrb[12].mxu1 %v650_v41  ;;  %1939 = vmatprep.mubr.msk.f32.mxu0 %vm405_vm0, %v370_v39 }
  0x45   : > { %1956 = vmatprep.mubr.msk.f32.mxu1 %vm405_vm0, %v653_v43 }
  0x47   : > { %554 = vmatmul.mubr.f32.gmra.mrb[14].mxu0 %v369_v42 }
  0x48   : > { %836 = vmatmul.mubr.f32.gmra.mrb[14].mxu1 %v652_v46  ;;  %1940 = vmatprep.mubr.msk.f32.mxu0 %vm405_vm0, %v372_v44 }
  0x49   : > { %1957 = vmatprep.mubr.msk.f32.mxu1 %vm405_vm0, %v655_v48 }
  0x4b   : > { %559 = vmatmul.mubr.f32.gmra.mrb[16].mxu0 %v371_v47 }
  0x4c   : > { %841 = vmatmul.mubr.f32.gmra.mrb[16].mxu1 %v654_v51  ;;  %1941 = vmatprep.mubr.msk.f32.mxu0 %vm405_vm0, %v374_v49 }
  0x4d   : > { %1958 = vmatprep.mubr.msk.f32.mxu1 %vm405_vm0, %v657_v53 }
  0x4f   : > { %564 = vmatmul.mubr.f32.gmra.mrb[18].mxu0 %v373_v52 }
  0x50   : > { %846 = vmatmul.mubr.f32.gmra.mrb[18].mxu1 %v656_v56  ;;  %1942 = vmatprep.mubr.msk.f32.mxu0 %vm405_vm0, %v376_v54 }
  0x51   : > { %1959 = vmatprep.mubr.msk.f32.mxu1 %vm405_vm0, %v659_v58 }
  0x53   : > { %569 = vmatmul.mubr.f32.gmra.mrb[20].mxu0 %v375_v57 }
  0x54   : > { %851 = vmatmul.mubr.f32.gmra.mrb[20].mxu1 %v658_v61  ;;  %1943 = vmatprep.mubr.msk.f32.mxu0 %vm405_vm0, %v378_v59 }
  0x55   : > { %1960 = vmatprep.mubr.msk.f32.mxu1 %vm405_vm0, %v661_v63 }
  0x57   : > { %574 = vmatmul.mubr.f32.gmra.mrb[22].mxu0 %v377_v62 }
  0x58   : > { %856 = vmatmul.mubr.f32.gmra.mrb[22].mxu1 %v660_v2  ;;  %1944 = vmatprep.mubr.msk.f32.mxu0 %vm405_vm0, %v380_v0 }
  0x59   : > { %1961 = vmatprep.mubr.msk.f32.mxu1 %vm405_vm0, %v663_v5 }
  0x5b   : > { %579 = vmatmul.mubr.f32.gmra.mrb[24].mxu0 %v379_v4 }
  0x5c   : > { %861 = vmatmul.mubr.f32.gmra.mrb[24].mxu1 %v662_v8  ;;  %1945 = vmatprep.mubr.msk.f32.mxu0 %vm405_vm0, %v382_v6 }
  0x5d   : > { %1962 = vmatprep.mubr.msk.f32.mxu1 %vm405_vm0, %v665_v10 }
  0x5f   : > { %584 = vmatmul.mubr.f32.gmra.mrb[26].mxu0 %v381_v9 }
  0x60   : > { %866 = vmatmul.mubr.f32.gmra.mrb[26].mxu1 %v664_v12  ;;  %1946 = vmatprep.mubr.msk.f32.mxu0 %vm405_vm0, %v384_v3 }
  0x61   : > { %1963 = vmatprep.mubr.msk.f32.mxu1 %vm405_vm0, %v667_v14 }
  0x63   : > { %589 = vmatmul.mubr.f32.gmra.mrb[28].mxu0 %v383_v13 }
  0x64   : > { %871 = vmatmul.mubr.f32.gmra.mrb[28].mxu1 %v666_v16  ;;  %1947 = vmatprep.mubr.msk.f32.mxu0 %vm405_vm0, %v386_v15 }
  0x65   : > { %1964 = vmatprep.mubr.msk.f32.mxu1 %vm405_vm0, %v669_v18 }
  0x67   : > { %594 = vmatmul.mubr.f32.gmra.mrb[30].mxu0 %v385_v17 }
  0x68   : > { %876 = vmatmul.mubr.f32.gmra.mrb[30].mxu1 %v668_v19 }
  0xfe   : > { %v2435_v22 = vpop.f32.mrb[0].mxu0 }
  0xff   : > { %v606_v23 = vadd.f32 %v2433_v21, %v2435_v22  ;;  %v802_v24 = vpop.f32.mrb[0].mxu1  ;;  %v522_v25 = vpop.f32.mrb[1].mxu0 }
 0x100   : > { %913 = vrot.lane.b32.xlu0 %v802_v24, %s2153_s20  ;;  %v804_v26 = vpop.f32.mrb[1].mxu1 }
 0x101   : > { %v622_v27 = vmax.f32 %v606_v23, 0.0 }
 0x102   : > { %v2440_v28 = vpop.f32.mrb[2].mxu0 }
 0x103   : > { %v607_v29 = vadd.f32 %v2433_v21, %v2440_v28  ;;  %v807_v30 = vpop.f32.mrb[2].mxu1  ;;  %v527_v31 = vpop.f32.mrb[3].mxu0  ;;  %2030 = vmatprep.mubr.msk.f32.mxu0 %vm1008_vm1, %v622_v27 }
 0x104   : > { %915 = vrot.lane.b32.xlu0 %v807_v30, %s2153_s20  ;;  %v809_v32 = vpop.f32.mrb[3].mxu1 }
 0x105   : > { %v623_v33 = vmax.f32 %v607_v29, 0.0 }
 0x106   : > { %v2446_v34 = vpop.f32.mrb[4].mxu0 }
 0x107   : > { %v608_v35 = vadd.f32 %v2433_v21, %v2446_v34  ;;  %v812_v36 = vpop.f32.mrb[4].mxu1  ;;  %v532_v37 = vpop.f32.mrb[5].mxu0  ;;  %2031 = vmatmul.mubr.msk.f32.vlgmr.msra.gmra.mrb[32].mxu0 %vm1008_vm1, %v623_v33 }
 0x108   : > { %917 = vrot.lane.b32.xlu1 %v812_v36, %s2153_s20  ;;  %v814_v38 = vpop.f32.mrb[5].mxu1 }
 0x109   : > { %v624_v39 = vmax.f32 %v608_v35, 0.0 }
 0x10a   : > { %v2452_v40 = vpop.f32.mrb[6].mxu0 }
 0x10b   : > { %v609_v41 = vadd.f32 %v2433_v21, %v2452_v40  ;;  %v817_v42 = vpop.f32.mrb[6].mxu1  ;;  %v537_v43 = vpop.f32.mrb[7].mxu0  ;;  %2033 = vmatprep.mubr.msk.f32.mxu0 %vm1008_vm1, %v624_v39 }
 0x10c   : > { %919 = vrot.lane.b32.xlu1 %v817_v42, %s2153_s20  ;;  %v819_v44 = vpop.f32.mrb[7].mxu1 }
 0x10d   : > { %v625_v45 = vmax.f32 %v609_v41, 0.0 }
 0x10e   : > { %v2458_v46 = vpop.f32.mrb[8].mxu0 }
 0x10f   : > { %v822_v47 = vpop.f32.mrb[8].mxu1  ;;  %2034 = vmatmul.mubr.msk.f32.gmra.mrb[34].mxu0 %vm1008_vm1, %v625_v45  ;;  %v610_v48 = vadd.f32 %v2433_v21, %v2458_v46  ;;  %v542_v49 = vpop.f32.mrb[9].mxu0 }
 0x110   : > { %921 = vrot.lane.b32.xlu0 %v822_v47, %s2153_s20  ;;  %v824_v50 = vpop.f32.mrb[9].mxu1 }
 0x111   : > { %v626_v51 = vmax.f32 %v610_v48, 0.0 }
 0x112   : > { %v2464_v52 = vpop.f32.mrb[10].mxu0 }
 0x113   : > { %v827_v53 = vpop.f32.mrb[10].mxu1  ;;  %v611_v54 = vadd.f32 %v2433_v21, %v2464_v52  ;;  %v547_v55 = vpop.f32.mrb[11].mxu0  ;;  %2036 = vmatprep.mubr.msk.f32.mxu0 %vm1008_vm1, %v626_v51 }
 0x114   : > { %923 = vrot.lane.b32.xlu1 %v827_v53, %s2153_s20  ;;  %v829_v56 = vpop.f32.mrb[11].mxu1 }
 0x115   : > { %v627_v57 = vmax.f32 %v611_v54, 0.0 }
 0x116   : > { %v2470_v58 = vpop.f32.mrb[12].mxu0 }
 0x117   : > { %v832_v59 = vpop.f32.mrb[12].mxu1  ;;  %2037 = vmatmul.mubr.msk.f32.gmra.mrb[36].mxu0 %vm1008_vm1, %v627_v57  ;;  %v612_v60 = vadd.f32 %v2433_v21, %v2470_v58  ;;  %v552_v61 = vpop.f32.mrb[13].mxu0 }
 0x118   : > { %925 = vrot.lane.b32.xlu0 %v832_v59, %s2153_s20  ;;  %v834_v62 = vpop.f32.mrb[13].mxu1 }
 0x119   : > { %v628_v63 = vmax.f32 %v612_v60, 0.0  ;;  %v2531_v62 = vpop.permute.xlu0 %1224 }
 0x11a   : > { %v2476_v0 = vpop.f32.mrb[14].mxu0 }
 0x11b   : > { %v837_v1 = vpop.f32.mrb[14].mxu1  ;;  %v613_v2 = vadd.f32 %v2433_v21, %v2476_v0  ;;  %v557_v4 = vpop.f32.mrb[15].mxu0  ;;  %2039 = vmatprep.mubr.msk.f32.mxu0 %vm1008_vm1, %v628_v63  ;;  %v881_v63 = vmul.f32 %v2435_v22, %v2435_v22 }
 0x11c   : > { %927 = vrot.lane.b32.xlu1 %v837_v1, %s2153_s20  ;;  %v839_v5 = vpop.f32.mrb[15].mxu1  ;;  %v2535_v4 = vpop.permute.xlu1 %1447 }
 0x11d   : > { %v629_v6 = vmax.f32 %v613_v2, 0.0 }
 0x11e   : > { %v2482_v7 = vpop.f32.mrb[16].mxu0 }
 0x11f   : > { %v842_v8 = vpop.f32.mrb[16].mxu1  ;;  %2040 = vmatmul.mubr.msk.f32.gmra.mrb[38].mxu0 %vm1008_vm1, %v629_v6  ;;  %v614_v9 = vadd.f32 %v2433_v21, %v2482_v7  ;;  %v562_v10 = vpop.f32.mrb[17].mxu0 }
 0x120   : > { %929 = vrot.lane.b32.xlu0 %v842_v8, %s2153_s20  ;;  %v844_v3 = vpop.f32.mrb[17].mxu1  ;;  %v883_v10 = vmul.f32 %v2446_v34, %v2446_v34 }
 0x121   : > { %v630_v11 = vmax.f32 %v614_v9, 0.0 }
 0x122   : > { %v2488_v12 = vpop.f32.mrb[18].mxu0 }
 0x123   : > { %v847_v13 = vpop.f32.mrb[18].mxu1  ;;  %v615_v14 = vadd.f32 %v2433_v21, %v2488_v12  ;;  %v567_v15 = vpop.f32.mrb[19].mxu0  ;;  %2042 = vmatprep.mubr.msk.f32.mxu1 %vm1008_vm1, %v630_v11 }
 0x124   : > { %931 = vrot.lane.b32.xlu1 %v847_v13, %s2153_s20  ;;  %v849_v16 = vpop.f32.mrb[19].mxu1 }
 0x125   : > { %v631_v17 = vmax.f32 %v615_v14, 0.0  ;;  %v884_v16 = vmul.f32 %v2452_v40, %v2452_v40 }
 0x126   : > { %v2494_v18 = vpop.f32.mrb[20].mxu0 }
 0x127   : > { %v852_v19 = vpop.f32.mrb[20].mxu1  ;;  %2043 = vmatmul.mubr.msk.f32.vlgmr.msra.gmra.mrb[32].mxu1 %vm1008_vm1, %v631_v17  ;;  %v616_v20 = vadd.f32 %v2433_v21, %v2494_v18  ;;  %v572_v23 = vpop.f32.mrb[21].mxu0 }
 0x128   : > { %933 = vrot.lane.b32.xlu0 %v852_v19, %s2153_s20  ;;  %v854_v24 = vpop.f32.mrb[21].mxu1 }
 0x129   : > { %v632_v25 = vmax.f32 %v616_v20, 0.0 }
 0x12a   : > { %v2500_v26 = vpop.f32.mrb[22].mxu0 }
 0x12b   : > { %v857_v27 = vpop.f32.mrb[22].mxu1  ;;  %v617_v29 = vadd.f32 %v2433_v21, %v2500_v26  ;;  %v577_v30 = vpop.f32.mrb[23].mxu0  ;;  %2045 = vmatprep.mubr.msk.f32.mxu1 %vm1008_vm1, %v632_v25  ;;  %v885_v25 = vmul.f32 %v2458_v46, %v2458_v46 }
 0x12c   : > { %935 = vrot.lane.b32.xlu1 %v857_v27, %s2153_s20  ;;  %v859_v31 = vpop.f32.mrb[23].mxu1 }
 0x12d   : > { %v633_v32 = vmax.f32 %v617_v29, 0.0 }
 0x12e   : > { %v2506_v33 = vpop.f32.mrb[24].mxu0 }
 0x12f   : > { %v862_v35 = vpop.f32.mrb[24].mxu1  ;;  %2046 = vmatmul.mubr.msk.f32.gmra.mrb[34].mxu1 %vm1008_vm1, %v633_v32  ;;  %v618_v36 = vadd.f32 %v2433_v21, %v2506_v33  ;;  %v582_v37 = vpop.f32.mrb[25].mxu0 }
 0x130   : > { %937 = vrot.lane.b32.xlu0 %v862_v35, %s2153_s20  ;;  %v864_v38 = vpop.f32.mrb[25].mxu1  ;;  %v886_v35 = vmul.f32 %v2464_v52, %v2464_v52 }
 0x131   : > { %v634_v39 = vmax.f32 %v618_v36, 0.0 }
 0x132   : > { %v2512_v41 = vpop.f32.mrb[26].mxu0 }
 0x133   : > { %v867_v42 = vpop.f32.mrb[26].mxu1  ;;  %v619_v43 = vadd.f32 %v2433_v21, %v2512_v41  ;;  %v587_v44 = vpop.f32.mrb[27].mxu0  ;;  %2048 = vmatprep.mubr.msk.f32.mxu1 %vm1008_vm1, %v634_v39 }
 0x134   : > { %939 = vrot.lane.b32.xlu1 %v867_v42, %s2153_s20  ;;  %v869_v45 = vpop.f32.mrb[27].mxu1 }
 0x135   : > { %v635_v47 = vmax.f32 %v619_v43, 0.0  ;;  %v887_v43 = vmul.f32 %v2470_v58, %v2470_v58 }
 0x136   : > { %v2518_v48 = vpop.f32.mrb[28].mxu0 }
 0x137   : > { %v872_v49 = vpop.f32.mrb[28].mxu1  ;;  %2049 = vmatmul.mubr.msk.f32.gmra.mrb[36].mxu1 %vm1008_vm1, %v635_v47  ;;  %v620_v50 = vadd.f32 %v2433_v21, %v2518_v48  ;;  %v592_v51 = vpop.f32.mrb[29].mxu0 }
 0x138   : > { %941 = vrot.lane.b32.xlu0 %v872_v49, %s2153_s20  ;;  %v874_v53 = vpop.f32.mrb[29].mxu1  ;;  %v888_v51 = vmul.f32 %v2476_v0, %v2476_v0 }
 0x139   : > { %v636_v54 = vmax.f32 %v620_v50, 0.0 }
 0x13a   : > { %v2524_v55 = vpop.f32.mrb[30].mxu0 }
 0x13b   : > { %v877_v56 = vpop.f32.mrb[30].mxu1  ;;  %v621_v57 = vadd.f32 %v2433_v21, %v2524_v55  ;;  %v597_v59 = vpop.f32.mrb[31].mxu0  ;;  %2051 = vmatprep.mubr.msk.f32.mxu1 %vm1008_vm1, %v636_v54  ;;  %v882_v21 = vmul.f32 %v2440_v28, %v2440_v28 }
 0x13c   : > { %943 = vrot.lane.b32.xlu1 %v877_v56, %s2153_s20  ;;  %v879_v60 = vpop.f32.mrb[31].mxu1 }
 0x13d   : > { %v637_v61 = vmax.f32 %v621_v57, 0.0  ;;  %v889_v60 = vmul.f32 %v2482_v7, %v2482_v7 }
 0x13f   : > { %2052 = vmatmul.mubr.msk.f32.gmra.mrb[38].mxu1 %vm1008_vm1, %v637_v61 }
 0x172   : > { %v914_v1 = vpop.permute.xlu0 %913 }
 0x173   : > { %v961_v2 = vsub.f32 %v881_v63, %v914_v1 }
 0x175   : > { %v977_v5 = vmul.f32 0.5, %v961_v2 }
 0x176   : > { %v916_v6 = vpop.permute.xlu0 %915 }
 0x177   : > { %v962_v8 = vsub.f32 %v882_v21, %v916_v6  ;;  %v1227_v9 = vmul.f32 %v2531_v62, %v977_v5  ;;  %v1450_v14 = vmul.f32 %v2535_v4, %v977_v5  ;;  %v890_v5 = vmul.f32 %v2488_v12, %v2488_v12 }
 0x179   : > { %v978_v3 = vmul.f32 0.5, %v962_v8  ;;  %1259 = vrot.lane.b32.xlu0 %v1227_v9, %s2153_s20 }
 0x17a   : > { %v918_v11 = vpop.permute.xlu1 %917 }
 0x17b   : > { %v963_v13 = vsub.f32 %v883_v10, %v918_v11  ;;  %v1228_v15 = vmul.f32 %v2531_v62, %v978_v3  ;;  %v1451_v23 = vmul.f32 %v2535_v4, %v978_v3  ;;  %v891_v11 = vmul.f32 %v2494_v18, %v2494_v18 }
 0x17d   : > { %v979_v17 = vmul.f32 0.5, %v963_v13  ;;  %1482 = vrot.lane.b32.xlu0 %v1450_v14, %s2153_s20  ;;  %1261 = vrot.lane.b32.xlu1 %v1228_v15, %s2153_s20 }
 0x17e   : > { %v920_v19 = vpop.permute.xlu1 %919 }
 0x17f   : > { %v964_v20 = vsub.f32 %v884_v16, %v920_v19  ;;  %v1229_v24 = vmul.f32 %v2531_v62, %v979_v17  ;;  %v1452_v31 = vmul.f32 %v2535_v4, %v979_v17  ;;  %v892_v19 = vmul.f32 %v2500_v26, %v2500_v26 }
 0x181   : > { %v980_v27 = vmul.f32 0.5, %v964_v20  ;;  %1484 = vrot.lane.b32.xlu1 %v1451_v23, %s2153_s20  ;;  %1263 = vrot.lane.b32.xlu0 %v1229_v24, %s2153_s20 }
 0x182   : > { %v922_v29 = vpop.permute.xlu0 %921 }
 0x183   : > { %v965_v30 = vsub.f32 %v885_v25, %v922_v29  ;;  %v1230_v32 = vmul.f32 %v2531_v62, %v980_v27  ;;  %v1453_v39 = vmul.f32 %v2535_v4, %v980_v27  ;;  %v893_v29 = vmul.f32 %v2506_v33, %v2506_v33 }
 0x185   : > { %v981_v36 = vmul.f32 0.5, %v965_v30  ;;  %1486 = vrot.lane.b32.xlu0 %v1452_v31, %s2153_s20  ;;  %1265 = vrot.lane.b32.xlu1 %v1230_v32, %s2153_s20 }
 0x186   : > { %v924_v37 = vpop.permute.xlu1 %923 }
 0x187   : > { %v966_v38 = vsub.f32 %v886_v35, %v924_v37  ;;  %v1231_v42 = vmul.f32 %v2531_v62, %v981_v36  ;;  %v1454_v49 = vmul.f32 %v2535_v4, %v981_v36  ;;  %v894_v37 = vmul.f32 %v2512_v41, %v2512_v41 }
 0x189   : > { %v982_v44 = vmul.f32 0.5, %v966_v38  ;;  %1488 = vrot.lane.b32.xlu1 %v1453_v39, %s2153_s20  ;;  %1267 = vrot.lane.b32.xlu0 %v1231_v42, %s2153_s20 }
 0x18a   : > { %v926_v45 = vpop.permute.xlu0 %925 }
 0x18b   : > { %v967_v47 = vsub.f32 %v887_v43, %v926_v45  ;;  %v1232_v50 = vmul.f32 %v2531_v62, %v982_v44  ;;  %v1455_v57 = vmul.f32 %v2535_v4, %v982_v44  ;;  %v895_v45 = vmul.f32 %v2518_v48, %v2518_v48 }
 0x18d   : > { %v983_v53 = vmul.f32 0.5, %v967_v47  ;;  %1490 = vrot.lane.b32.xlu0 %v1454_v49, %s2153_s20  ;;  %1269 = vrot.lane.b32.xlu1 %v1232_v50, %s2153_s20 }
 0x18e   : > { %v928_v54 = vpop.permute.xlu1 %927 }
 0x18f   : > { %v968_v56 = vsub.f32 %v888_v51, %v928_v54  ;;  %v1233_v59 = vmul.f32 %v2531_v62, %v983_v53  ;;  %v1456_v2 = vmul.f32 %v2535_v4, %v983_v53  ;;  %v896_v54 = vmul.f32 %v2524_v55, %v2524_v55 }
 0x191   : > { %v984_v61 = vmul.f32 0.5, %v968_v56  ;;  %1492 = vrot.lane.b32.xlu1 %v1455_v57, %s2153_s20  ;;  %1271 = vrot.lane.b32.xlu0 %v1233_v59, %s2153_s20 }
 0x192   : > { %v930_v63 = vpop.permute.xlu0 %929 }
 0x193   : > { %v969_v1 = vsub.f32 %v889_v60, %v930_v63  ;;  %v1234_v21 = vmul.f32 %v2531_v62, %v984_v61  ;;  %v1457_v10 = vmul.f32 %v2535_v4, %v984_v61 }
 0x195   : > { %v985_v6 = vmul.f32 0.5, %v969_v1  ;;  %1494 = vrot.lane.b32.xlu0 %v1456_v2, %s2153_s20  ;;  %1273 = vrot.lane.b32.xlu1 %v1234_v21, %s2153_s20 }
 0x196   : > { %v932_v8 = vpop.permute.xlu1 %931 }
 0x197   : > { %v970_v9 = vsub.f32 %v890_v5, %v932_v8  ;;  %v1235_v3 = vmul.f32 %v2531_v62, %v985_v6  ;;  %v1458_v16 = vmul.f32 %v2535_v4, %v985_v6  ;;  %v2634_v5 = vld [vmem:[%s2907_s5] ss:$0 sm:$0xff] }
 0x199   : > { %v986_v13 = vmul.f32 0.5, %v970_v9  ;;  %1496 = vrot.lane.b32.xlu1 %v1457_v10, %s2153_s20  ;;  %1275 = vrot.lane.b32.xlu0 %v1235_v3, %s2153_s20 }
 0x19a   : > { %v934_v14 = vpop.permute.xlu0 %933 }
 0x19b   : > { %v971_v15 = vsub.f32 %v891_v11, %v934_v14  ;;  %v1236_v17 = vmul.f32 %v2531_v62, %v986_v13  ;;  %v1459_v25 = vmul.f32 %v2535_v4, %v986_v13  ;;  %v2646_v11 = vld [vmem:[%s2909_s7 + $0x1] ss:$0 sm:$0xff] }
 0x19d   : > { %v987_v20 = vmul.f32 0.5, %v971_v15  ;;  %1498 = vrot.lane.b32.xlu0 %v1458_v16, %s2153_s20  ;;  %1277 = vrot.lane.b32.xlu1 %v1236_v17, %s2153_s20 }
 0x19e   : > { %v936_v23 = vpop.permute.xlu1 %935 }
 0x19f   : > { %v972_v24 = vsub.f32 %v892_v19, %v936_v23  ;;  %v1237_v27 = vmul.f32 %v2531_v62, %v987_v20  ;;  %v1460_v35 = vmul.f32 %v2535_v4, %v987_v20 }
 0x1a1   : > { %v988_v30 = vmul.f32 0.5, %v972_v24  ;;  %1500 = vrot.lane.b32.xlu1 %v1459_v25, %s2153_s20  ;;  %1279 = vrot.lane.b32.xlu0 %v1237_v27, %s2153_s20 }
 0x1a2   : > { %v938_v31 = vpop.permute.xlu0 %937 }
 0x1a3   : > { %v973_v32 = vsub.f32 %v893_v29, %v938_v31  ;;  %v1238_v36 = vmul.f32 %v2531_v62, %v988_v30  ;;  %v1461_v43 = vmul.f32 %v2535_v4, %v988_v30 }
 0x1a5   : > { %v989_v38 = vmul.f32 0.5, %v973_v32  ;;  %1502 = vrot.lane.b32.xlu0 %v1460_v35, %s2153_s20  ;;  %1281 = vrot.lane.b32.xlu1 %v1238_v36, %s2153_s20 }
 0x1a6   : > { %v940_v39 = vpop.permute.xlu1 %939 }
 0x1a7   : > { %v974_v42 = vsub.f32 %v894_v37, %v940_v39  ;;  %v1239_v44 = vmul.f32 %v2531_v62, %v989_v38  ;;  %v1462_v51 = vmul.f32 %v2535_v4, %v989_v38 }
 0x1a9   : > { %v990_v47 = vmul.f32 0.5, %v974_v42  ;;  %1504 = vrot.lane.b32.xlu1 %v1461_v43, %s2153_s20  ;;  %1283 = vrot.lane.b32.xlu0 %v1239_v44, %s2153_s20 }
 0x1aa   : > { %v942_v49 = vpop.permute.xlu0 %941 }
 0x1ab   : > { %v975_v50 = vsub.f32 %v895_v45, %v942_v49  ;;  %v1240_v53 = vmul.f32 %v2531_v62, %v990_v47  ;;  %v1463_v60 = vmul.f32 %v2535_v4, %v990_v47 }
 0x1ad   : > { %v991_v56 = vmul.f32 0.5, %v975_v50  ;;  %1506 = vrot.lane.b32.xlu0 %v1462_v51, %s2153_s20  ;;  %1285 = vrot.lane.b32.xlu1 %v1240_v53, %s2153_s20 }
 0x1ae   : > { %v944_v57 = vpop.permute.xlu1 %943 }
 0x1af   : > { %v976_v59 = vsub.f32 %v896_v54, %v944_v57  ;;  %v1241_v61 = vmul.f32 %v2531_v62, %v991_v56  ;;  %v1464_v1 = vmul.f32 %v2535_v4, %v991_v56 }
 0x1b1   : > { %v992_v63 = vmul.f32 0.5, %v976_v59  ;;  %1508 = vrot.lane.b32.xlu1 %v1463_v60, %s2153_s20  ;;  %1287 = vrot.lane.b32.xlu0 %v1241_v61, %s2153_s20 }
 0x1b3   : > { %v1242_v2 = vmul.f32 %v2531_v62, %v992_v63  ;;  %v1465_v21 = vmul.f32 %v2535_v4, %v992_v63  ;;  %v2641_v62 = vld [vmem:[%s2909_s7] ss:$0 sm:$0xff] }
 0x1b5   : > { %1510 = vrot.lane.b32.xlu0 %v1464_v1, %s2153_s20  ;;  %1289 = vrot.lane.b32.xlu1 %v1242_v2, %s2153_s20 }
 0x1b9   : > { %1512 = vrot.lane.b32.xlu1 %v1465_v21, %s2153_s20 }
 0x1da   : > { %v2032_v6 = vpop.f32.mrb[32].mxu0 }
 0x1db   : > { %v1129_v8 = vadd.f32 %v2032_v6, %v2634_v5  ;;  %v1123_v9 = vpop.f32.mrb[33].mxu0 }
 0x1dc   : > { %v1124_v10 = vadd.f32 %v2634_v5, %v1123_v9 }
 0x1dd   : > { %v1203_v3 = vmax.f32 %v1129_v8, 0.0 }
 0x1de   : > { %v1202_v4 = vmax.f32 %v1124_v10, 0.0 }
 0x1df   : > { %v1361_v13 = vmul.f32 %v2641_v62, %v1203_v3  ;;  %v1584_v16 = vmul.f32 %v2646_v11, %v1203_v3 }
 0x1e0   : > { %v1360_v14 = vmul.f32 %v2641_v62, %v1202_v4  ;;  %v1583_v20 = vmul.f32 %v2646_v11, %v1202_v4 }
 0x1e1   : > { %v1380_v15 = vsel %vm1376_vm2, %v1361_v13, 0.0  ;;  %v1602_v29 = vsel %vm1376_vm2, %v1584_v16, 0.0 }
 0x1e2   : > { %1381 = vadd.xlane.f32.xlu0 %v1380_v15  ;;  %v2035_v17 = vpop.f32.mrb[34].mxu0  ;;  %v1377_v19 = vsel %vm1376_vm2, %v1360_v14, 0.0  ;;  %v1599_v31 = vsel %vm1376_vm2, %v1583_v20, 0.0 }
 0x1e3   : > { %v1139_v23 = vadd.f32 %v2035_v17, %v2634_v5  ;;  %v1133_v24 = vpop.f32.mrb[35].mxu0  ;;  %1378 = vadd.xlane.f32.xlu1 %v1377_v19 }
 0x1e4   : > { %v1134_v25 = vadd.f32 %v2634_v5, %v1133_v24 }
 0x1e5   : > { %v1205_v27 = vmax.f32 %v1139_v23, 0.0 }
 0x1e6   : > { %v1204_v30 = vmax.f32 %v1134_v25, 0.0  ;;  %1603 = vadd.xlane.f32.xlu0 %v1602_v29 }
 0x1e7   : > { %1600 = vadd.xlane.f32.xlu1 %v1599_v31  ;;  %v1363_v32 = vmul.f32 %v2641_v62, %v1205_v27  ;;  %v1586_v37 = vmul.f32 %v2646_v11, %v1205_v27 }
 0x1e8   : > { %v1362_v35 = vmul.f32 %v2641_v62, %v1204_v30  ;;  %v1585_v39 = vmul.f32 %v2646_v11, %v1204_v30 }
 0x1e9   : > { %v1386_v36 = vsel %vm1376_vm2, %v1363_v32, 0.0  ;;  %v1608_v49 = vsel %vm1376_vm2, %v1586_v37, 0.0 }
 0x1ea   : > { %1387 = vadd.xlane.f32.xlu0 %v1386_v36  ;;  %v1383_v38 = vsel %vm1376_vm2, %v1362_v35, 0.0  ;;  %v2038_v42 = vpop.f32.mrb[36].mxu0  ;;  %v1605_v50 = vsel %vm1376_vm2, %v1585_v39, 0.0 }
 0x1eb   : > { %v1260_v43 = vpop.permute.xlu0 %1259  ;;  %1384 = vadd.xlane.f32.xlu1 %v1383_v38  ;;  %v1149_v44 = vadd.f32 %v2038_v42, %v2634_v5  ;;  %v1143_v45 = vpop.f32.mrb[37].mxu0 }
 0x1ec   : > { %v1144_v47 = vadd.f32 %v2634_v5, %v1143_v45  ;;  %v1307_v57 = vsel %vm405_vm0, %v1260_v43, 0.0 }
 0x1ed   : > { %v1207_v54 = vmax.f32 %v1149_v44, 0.0 }
 0x1ee   : > { %1609 = vadd.xlane.f32.xlu0 %v1608_v49  ;;  %v1206_v56 = vmax.f32 %v1144_v47, 0.0 }
 0x1ef   : > { %v1483_v51 = vpop.permute.xlu0 %1482  ;;  %v1262_v53 = vpop.permute.xlu1 %1261  ;;  %1606 = vadd.xlane.f32.xlu1 %v1605_v50  ;;  %v1365_v63 = vmul.f32 %v2641_v62, %v1207_v54  ;;  %v1588_v3 = vmul.f32 %v2646_v11, %v1207_v54 }
 0x1f0   : > { %v1530_v59 = vsel %vm405_vm0, %v1483_v51, 0.0  ;;  %v1364_v1 = vmul.f32 %v2641_v62, %v1206_v56  ;;  %v1310_v6 = vsel %vm405_vm0, %v1262_v53, 0.0  ;;  %v1587_v4 = vmul.f32 %v2646_v11, %v1206_v56 }
 0x1f1   : > { %v1392_v8 = vsel %vm1376_vm2, %v1365_v63, 0.0  ;;  %v1614_v20 = vsel %vm1376_vm2, %v1588_v3, 0.0 }
 0x1f2   : > { %1308 = vadd.xlane.f32.xlu0 %v1307_v57  ;;  %v2041_v60 = vpop.f32.mrb[38].mxu0  ;;  %v1389_v9 = vsel %vm1376_vm2, %v1364_v1, 0.0  ;;  %v1611_v24 = vsel %vm1376_vm2, %v1587_v4, 0.0 }
 0x1f3   : > { %v1485_v61 = vpop.permute.xlu1 %1484  ;;  %1531 = vadd.xlane.f32.xlu1 %v1530_v59  ;;  %v1153_v2 = vpop.f32.mrb[39].mxu0  ;;  %v1159_v14 = vadd.f32 %v2041_v60, %v2634_v5 }
 0x1f4   : > { %v1533_v21 = vsel %vm405_vm0, %v1485_v61, 0.0  ;;  %v1264_v10 = vpop.permute.xlu0 %1263  ;;  %v1154_v17 = vadd.f32 %v2634_v5, %v1153_v2 }
 0x1f5   : > { %v1209_v27 = vmax.f32 %v1159_v14, 0.0  ;;  %v1313_v31 = vsel %vm405_vm0, %v1264_v10, 0.0 }
 0x1f6   : > { %1534 = vadd.xlane.f32.xlu0 %v1533_v21  ;;  %v1208_v30 = vmax.f32 %v1154_v17, 0.0 }
 0x1f7   : > { %1311 = vadd.xlane.f32.xlu1 %v1310_v6  ;;  %v1266_v16 = vpop.permute.xlu1 %1265  ;;  %v1367_v38 = vmul.f32 %v2641_v62, %v1209_v27  ;;  %v1590_v59 = vmul.f32 %v2646_v11, %v1209_v27 }
 0x1f8   : > { %v1487_v25 = vpop.permute.xlu0 %1486  ;;  %v1366_v42 = vmul.f32 %v2641_v62, %v1208_v30  ;;  %v1316_v49 = vsel %vm405_vm0, %v1266_v16, 0.0  ;;  %v1589_v21 = vmul.f32 %v2646_v11, %v1208_v30 }
 0x1f9   : > { %v1536_v36 = vsel %vm405_vm0, %v1487_v25, 0.0  ;;  %v1398_v50 = vsel %vm1376_vm2, %v1367_v38, 0.0 }
 0x1fa   : > { %1393 = vadd.xlane.f32.xlu0 %v1392_v8  ;;  %v2044_v13 = vpop.f32.mrb[32].mxu1  ;;  %v1395_v56 = vsel %vm1376_vm2, %v1366_v42, 0.0  ;;  %v1617_v17 = vsel %vm1376_vm2, %v1589_v21, 0.0 }
 0x1fb   : > { %1390 = vadd.xlane.f32.xlu1 %v1389_v9  ;;  %v2680_v15 = vadd.f32 %v2044_v13, %v2634_v5  ;;  %v1163_v19 = vpop.f32.mrb[33].mxu1  ;;  %v1489_v35 = vpop.permute.xlu1 %1488  ;;  %v1620_v13 = vsel %vm1376_vm2, %v1590_v59, 0.0 }
 0x1fc   : > { %v1539_v44 = vsel %vm405_vm0, %v1489_v35, 0.0  ;;  %v1164_v57 = vadd.f32 %v2634_v5, %v1163_v19  ;;  %v1268_v60 = vpop.permute.xlu0 %1267 }
 0x1fd   : > { %v1211_v23 = vmax.f32 %v2680_v15, 0.0 }
 0x1fe   : > { %1615 = vadd.xlane.f32.xlu0 %v1614_v20  ;;  %v1210_v3 = vmax.f32 %v1164_v57, 0.0 }
 0x1ff   : > { %1612 = vadd.xlane.f32.xlu1 %v1611_v24  ;;  %v1592_v29 = vmul.f32 %v2646_v11, %v1211_v23  ;;  %v1270_v20 = vpop.permute.xlu1 %1269 }
 0x200   : > { %v1491_v19 = vpop.permute.xlu0 %1490  ;;  %v1368_v30 = vmul.f32 %v2641_v62, %v1210_v3 }
 0x201   : > { %v2691_v32 = vsel %vm1376_vm2, %v1592_v29, 0.0  ;;  %v1319_v29 = vsel %vm405_vm0, %v1268_v60, 0.0  ;;  %v1542_v38 = vsel %vm405_vm0, %v1491_v19, 0.0 }
 0x202   : > { %1314 = vadd.xlane.f32.xlu0 %v1313_v31  ;;  %v2047_v37 = vpop.f32.mrb[34].mxu1 }
 0x203   : > { %1537 = vadd.xlane.f32.xlu1 %v1536_v36  ;;  %v1179_v39 = vadd.f32 %v2047_v37, %v2634_v5  ;;  %v1173_v43 = vpop.f32.mrb[35].mxu1 }
 0x204   : > { %v1174_v47 = vadd.f32 %v2634_v5, %v1173_v43 }
 0x205   : > { %v1213_v45 = vmax.f32 %v1179_v39, 0.0 }
 0x206   : > { %1540 = vadd.xlane.f32.xlu0 %v1539_v44  ;;  %v1212_v51 = vmax.f32 %v1174_v47, 0.0 }
 0x207   : > { %1317 = vadd.xlane.f32.xlu1 %v1316_v49  ;;  %v1371_v53 = vmul.f32 %v2641_v62, %v1213_v45  ;;  %v1594_v54 = vmul.f32 %v2646_v11, %v1213_v45  ;;  %v1401_v45 = vsel %vm1376_vm2, %v1368_v30, 0.0  ;;  %v1493_v49 = vpop.permute.xlu1 %1492 }
 0x208   : > { %v1370_v61 = vmul.f32 %v2641_v62, %v1212_v51  ;;  %v1593_v63 = vmul.f32 %v2646_v11, %v1212_v51  ;;  %v1545_v60 = vsel %vm405_vm0, %v1493_v49, 0.0 }
 0x209   : > { %v2709_v1 = vsel %vm1376_vm2, %v1371_v53, 0.0  ;;  %v2712_v2 = vsel %vm1376_vm2, %v1594_v54, 0.0  ;;  %v1591_v54 = vmul.f32 %v2646_v11, %v1210_v3 }
 0x20a   : > { %1399 = vadd.xlane.f32.xlu0 %v1398_v50  ;;  %v2050_v6 = vpop.f32.mrb[36].mxu1  ;;  %v2716_v8 = vsel %vm1376_vm2, %v1370_v61, 0.0  ;;  %v2719_v9 = vsel %vm1376_vm2, %v1593_v63, 0.0  ;;  %v1322_v50 = vsel %vm405_vm0, %v1270_v20, 0.0  ;;  %v1369_v61 = vmul.f32 %v2641_v62, %v1211_v23  ;;  %v1272_v63 = vpop.permute.xlu0 %1271 }
 0x20b   : > { %1396 = vadd.xlane.f32.xlu1 %v1395_v56  ;;  %v1189_v10 = vadd.f32 %v2050_v6, %v2634_v5  ;;  %v1183_v4 = vpop.f32.mrb[37].mxu1  ;;  %v1623_v3 = vsel %vm1376_vm2, %v1591_v54, 0.0 }
 0x20c   : > { %v1184_v16 = vadd.f32 %v2634_v5, %v1183_v4  ;;  %v1404_v23 = vsel %vm1376_vm2, %v1369_v61, 0.0 }
 0x20d   : > { %v1215_v14 = vmax.f32 %v1189_v10, 0.0 }
 0x20e   : > { %1621 = vadd.xlane.f32.xlu0 %v1620_v13  ;;  %v1214_v25 = vmax.f32 %v1184_v16, 0.0  ;;  %v1274_v13 = vpop.permute.xlu1 %1273 }
 0x20f   : > { %1618 = vadd.xlane.f32.xlu1 %v1617_v17  ;;  %v1596_v24 = vmul.f32 %v2646_v11, %v1215_v14  ;;  %v1373_v27 = vmul.f32 %v2641_v62, %v1215_v14  ;;  %v1328_v16 = vsel %vm405_vm0, %v1274_v13, 0.0 }
 0x210   : > { %v1372_v31 = vmul.f32 %v2641_v62, %v1214_v25  ;;  %v1595_v35 = vmul.f32 %v2646_v11, %v1214_v25 }
 0x211   : > { %v2732_v36 = vsel %vm1376_vm2, %v1373_v27, 0.0  ;;  %v2735_v37 = vsel %vm1376_vm2, %v1596_v24, 0.0 }
 0x212   : > { %1320 = vadd.xlane.f32.xlu0 %v1319_v29  ;;  %v2053_v39 = vpop.f32.mrb[38].mxu1  ;;  %v1413_v42 = vsel %vm1376_vm2, %v1372_v31, 0.0  ;;  %v1635_v43 = vsel %vm1376_vm2, %v1595_v35, 0.0  ;;  %v1497_v17 = vpop.permute.xlu1 %1496 }
 0x213   : > { %1543 = vadd.xlane.f32.xlu1 %v1542_v38  ;;  %v1199_v44 = vadd.f32 %v2053_v39, %v2634_v5  ;;  %v1193_v47 = vpop.f32.mrb[39].mxu1  ;;  %v1551_v20 = vsel %vm405_vm0, %v1497_v17, 0.0 }
 0x214   : > { %v1194_v53 = vadd.f32 %v2634_v5, %v1193_v47 }
 0x215   : > { %v1217_v51 = vmax.f32 %v1199_v44, 0.0 }
 0x216   : > { %1323 = vadd.xlane.f32.xlu0 %v1322_v50  ;;  %v1216_v59 = vmax.f32 %v1194_v53, 0.0  ;;  %v1278_v25 = vpop.permute.xlu1 %1277 }
 0x217   : > { %1402 = vadd.xlane.f32.xlu1 %v1401_v45  ;;  %v1375_v56 = vmul.f32 %v2641_v62, %v1217_v51  ;;  %v1598_v57 = vmul.f32 %v2646_v11, %v1217_v51 }
 0x218   : > { %v1374_v21 = vmul.f32 %v2641_v62, %v1216_v59  ;;  %v1597_v5 = vmul.f32 %v2646_v11, %v1216_v59  ;;  %v1325_v62 = vsel %vm405_vm0, %v1272_v63, 0.0  ;;  %v1495_v11 = vpop.permute.xlu0 %1494 }
 0x219   : > { %v1422_v6 = vsel %vm1376_vm2, %v1375_v56, 0.0  ;;  %v2755_v10 = vsel %vm1376_vm2, %v1598_v57, 0.0  ;;  %v1548_v14 = vsel %vm405_vm0, %v1495_v11, 0.0 }
 0x21a   : > { %1546 = vadd.xlane.f32.xlu0 %v1545_v60  ;;  %v1419_v4 = vsel %vm1376_vm2, %v1374_v21, 0.0  ;;  %v2760_v15 = vsel %vm1376_vm2, %v1597_v5, 0.0  ;;  %v1501_v30 = vpop.permute.xlu1 %1500 }
 0x21b   : > { %1624 = vadd.xlane.f32.xlu1 %v1623_v3 }
 0x21c   : > { %v1276_v19 = vpop.permute.xlu0 %1275 }
 0x21d   : > { %v1331_v24 = vsel %vm405_vm0, %v1276_v19, 0.0 }
 0x21e   : > { %1405 = vadd.xlane.f32.xlu0 %v1404_v23  ;;  %v1282_v31 = vpop.permute.xlu1 %1281 }
 0x21f   : > { %1326 = vadd.xlane.f32.xlu1 %v1325_v62 }
 0x222   : > { %1627 = vadd.xlane.f32.xlu0 %v2691_v32  ;;  %v1499_v32 = vpop.permute.xlu0 %1498  ;;  %v1505_v38 = vpop.permute.xlu1 %1504 }
 0x223   : > { %1549 = vadd.xlane.f32.xlu1 %v1548_v14  ;;  %v1554_v27 = vsel %vm405_vm0, %v1499_v32, 0.0 }
 0x226   : > { %1329 = vadd.xlane.f32.xlu0 %v1328_v16  ;;  %v1280_v29 = vpop.permute.xlu0 %1279  ;;  %v1286_v45 = vpop.permute.xlu1 %1285 }
 0x227   : > { %1408 = vadd.xlane.f32.xlu1 %v2716_v8  ;;  %v1334_v8 = vsel %vm405_vm0, %v1278_v25, 0.0  ;;  %v1337_v35 = vsel %vm405_vm0, %v1280_v29, 0.0  ;;  %v1346_v50 = vsel %vm405_vm0, %v1286_v45, 0.0 }
 0x22a   : > { %1552 = vadd.xlane.f32.xlu0 %v1551_v20  ;;  %v1509_v49 = vpop.permute.xlu1 %1508 }
 0x22b   : > { %1630 = vadd.xlane.f32.xlu1 %v2719_v9  ;;  %v1557_v9 = vsel %vm405_vm0, %v1501_v30, 0.0  ;;  %v1569_v56 = vsel %vm405_vm0, %v1509_v49, 0.0 }
 0x22e   : > { %1411 = vadd.xlane.f32.xlu0 %v2709_v1  ;;  %v1503_v1 = vpop.permute.xlu0 %1502  ;;  %v1290_v54 = vpop.permute.xlu1 %1289 }
 0x22f   : > { %1332 = vadd.xlane.f32.xlu1 %v1331_v24  ;;  %v1560_v39 = vsel %vm405_vm0, %v1503_v1, 0.0  ;;  %v1352_v59 = vsel %vm405_vm0, %v1290_v54, 0.0 }
 0x232   : > { %1633 = vadd.xlane.f32.xlu0 %v2712_v2  ;;  %v1284_v2 = vpop.permute.xlu0 %1283  ;;  %v1513_v60 = vpop.permute.xlu1 %1512 }
 0x233   : > { %1555 = vadd.xlane.f32.xlu1 %v1554_v27  ;;  %v1575_v61 = vsel %vm405_vm0, %v1513_v60, 0.0 }
 0x236   : > { %1335 = vadd.xlane.f32.xlu0 %v1334_v8  ;;  %v1507_v44 = vpop.permute.xlu0 %1506 }
 0x237   : > { %1414 = vadd.xlane.f32.xlu1 %v1413_v42  ;;  %v1340_v42 = vsel %vm405_vm0, %v1282_v31, 0.0 }
 0x23a   : > { %1558 = vadd.xlane.f32.xlu0 %v1557_v9  ;;  %v1288_v47 = vpop.permute.xlu0 %1287 }
 0x23b   : > { %1636 = vadd.xlane.f32.xlu1 %v1635_v43  ;;  %v1563_v43 = vsel %vm405_vm0, %v1505_v38, 0.0  ;;  %v1349_v51 = vsel %vm405_vm0, %v1288_v47, 0.0 }
 0x23e   : > { %1417 = vadd.xlane.f32.xlu0 %v2732_v36  ;;  %v1343_v36 = vsel %vm405_vm0, %v1284_v2, 0.0  ;;  %v1511_v53 = vpop.permute.xlu0 %1510 }
 0x23f   : > { %1338 = vadd.xlane.f32.xlu1 %v1337_v35  ;;  %v1572_v57 = vsel %vm405_vm0, %v1511_v53, 0.0 }
 0x242   : > { %1639 = vadd.xlane.f32.xlu0 %v2735_v37  ;;  %v1566_v37 = vsel %vm405_vm0, %v1507_v44, 0.0 }
 0x243   : > { %1561 = vadd.xlane.f32.xlu1 %v1560_v39 }
 0x246   : > { %1341 = vadd.xlane.f32.xlu0 %v1340_v42 }
 0x247   : > { %1420 = vadd.xlane.f32.xlu1 %v1419_v4 }
 0x24a   : > { %1564 = vadd.xlane.f32.xlu0 %v1563_v43 }
 0x24b   : > { %1344 = vadd.xlane.f32.xlu1 %v1343_v36 }
 0x24e   : > { %1423 = vadd.xlane.f32.xlu0 %v1422_v6 }
 0x24f   : > { %1567 = vadd.xlane.f32.xlu1 %v1566_v37 }
 0x252   : > { %1347 = vadd.xlane.f32.xlu0 %v1346_v50 }
 0x253   : > { %1350 = vadd.xlane.f32.xlu1 %v1349_v51 }
 0x256   : > { %1570 = vadd.xlane.f32.xlu0 %v1569_v56 }
 0x257   : > { %1573 = vadd.xlane.f32.xlu1 %v1572_v57 }
 0x25a   : > { %1353 = vadd.xlane.f32.xlu0 %v1352_v59 }
 0x25b   : > { %1642 = vadd.xlane.f32.xlu1 %v2760_v15 }
 0x25e   : > { %1576 = vadd.xlane.f32.xlu0 %v1575_v61 }
 0x262   : > { %1645 = vadd.xlane.f32.xlu0 %v2755_v10 }
 0x26f   : > { %v1382_v63 = vpop.xlane.xlu0 %1381 }
 0x270   : > { %v1379_v21 = vpop.xlane.xlu1 %1378 }
 0x273   : > { %v1604_v5 = vpop.xlane.xlu0 %1603 }
 0x274   : > { %v1601_v6 = vpop.xlane.xlu1 %1600 }
 0x277   : > { %v1388_v3 = vpop.xlane.xlu0 %1387 }
 0x278   : > { %v1385_v4 = vpop.xlane.xlu1 %1384 }
 0x27b   : > { %v1610_v23 = vpop.xlane.xlu0 %1609 }
 0x27c   : > { %v1607_v62 = vpop.xlane.xlu1 %1606 }
 0x27f   : > { %v1309_v11 = vpop.xlane.xlu0 %1308 }
 0x280   : > { %v1425_v13 = vadd.f32 %v1379_v21, %v1309_v11  ;;  %v1532_v14 = vpop.xlane.xlu1 %1531 }
 0x281   : > { %v1647_v16 = vadd.f32 %v1601_v6, %v1532_v14 }
 0x283   : > { %v1535_v17 = vpop.xlane.xlu0 %1534  ;;  %v1664_v15 = vsel %vm1663_vm3, %v1425_v13, %v1647_v16 }
 0x284   : > { %v1648_v19 = vadd.f32 %v1604_v5, %v1535_v17  ;;  %1696 = vrot.lane.b32.xlu1 %v1664_v15, %s2154_s10  ;;  %v1312_v10 = vpop.xlane.xlu1 %1311 }
 0x285   : > { %v1426_v20 = vadd.f32 %v1382_v63, %v1312_v10 }
 0x287   : > { %v1394_v24 = vpop.xlane.xlu0 %1393  ;;  %v1665_v32 = vsel %vm1663_vm3, %v1426_v20, %v1648_v19 }
 0x288   : > { %1698 = vrot.lane.b32.xlu0 %v1665_v32, %s2154_s10  ;;  %v1391_v25 = vpop.xlane.xlu1 %1390 }
 0x28b   : > { %v1616_v27 = vpop.xlane.xlu0 %1615 }
 0x28c   : > { %v1613_v29 = vpop.xlane.xlu1 %1612 }
 0x28f   : > { %v1315_v8 = vpop.xlane.xlu0 %1314 }
 0x290   : > { %v1427_v30 = vadd.f32 %v1385_v4, %v1315_v8  ;;  %v1538_v9 = vpop.xlane.xlu1 %1537 }
 0x291   : > { %v1649_v1 = vadd.f32 %v1607_v62, %v1538_v9 }
 0x293   : > { %v1541_v31 = vpop.xlane.xlu0 %1540  ;;  %v1666_v35 = vsel %vm1663_vm3, %v1427_v30, %v1649_v1 }
 0x294   : > { %v1650_v2 = vadd.f32 %v1610_v23, %v1541_v31  ;;  %1700 = vrot.lane.b32.xlu1 %v1666_v35, %s2154_s10  ;;  %v1318_v38 = vpop.xlane.xlu1 %1317 }
 0x295   : > { %v1428_v39 = vadd.f32 %v1388_v3, %v1318_v38 }
 0x297   : > { %v1400_v42 = vpop.xlane.xlu0 %1399  ;;  %v1667_v44 = vsel %vm1663_vm3, %v1428_v39, %v1650_v2 }
 0x298   : > { %1702 = vrot.lane.b32.xlu1 %v1667_v44, %s2154_s10  ;;  %v1397_v45 = vpop.xlane.xlu1 %1396 }
 0x29b   : > { %v1622_v43 = vpop.xlane.xlu0 %1621 }
 0x29c   : > { %v1619_v36 = vpop.xlane.xlu1 %1618 }
 0x29f   : > { %v1321_v47 = vpop.xlane.xlu0 %1320 }
 0x2a0   : > { %v1429_v49 = vadd.f32 %v1391_v25, %v1321_v47  ;;  %v1544_v37 = vpop.xlane.xlu1 %1543 }
 0x2a1   : > { %v1651_v50 = vadd.f32 %v1613_v29, %v1544_v37 }
 0x2a3   : > { %v1324_v51 = vpop.xlane.xlu0 %1323  ;;  %v1668_v53 = vsel %vm1663_vm3, %v1429_v49, %v1651_v50 }
 0x2a4   : > { %1704 = vrot.lane.b32.xlu0 %v1668_v53, %s2154_s10  ;;  %v1403_v54 = vpop.xlane.xlu1 %1402  ;;  %v1430_v57 = vadd.f32 %v1394_v24, %v1324_v51 }
 0x2a7   : > { %v1547_v56 = vpop.xlane.xlu0 %1546 }
 0x2a8   : > { %v1652_v59 = vadd.f32 %v1616_v27, %v1547_v56  ;;  %v1625_v60 = vpop.xlane.xlu1 %1624 }
 0x2aa   : > { %v1669_v61 = vsel %vm1663_vm3, %v1430_v57, %v1652_v59 }
 0x2ab   : > { %v1406_v63 = vpop.xlane.xlu0 %1405  ;;  %1706 = vrot.lane.b32.xlu1 %v1669_v61, %s2154_s10 }
 0x2ac   : > { %v1327_v21 = vpop.xlane.xlu1 %1326 }
 0x2ad   : > { %v1431_v3 = vadd.f32 %v1397_v45, %v1327_v21 }
 0x2af   : > { %v1628_v5 = vpop.xlane.xlu0 %1627 }
 0x2b0   : > { %v1550_v6 = vpop.xlane.xlu1 %1549 }
 0x2b1   : > { %v1653_v4 = vadd.f32 %v1619_v36, %v1550_v6 }
 0x2b3   : > { %v1330_v23 = vpop.xlane.xlu0 %1329  ;;  %v1670_v62 = vsel %vm1663_vm3, %v1431_v3, %v1653_v4 }
 0x2b4   : > { %1708 = vrot.lane.b32.xlu0 %v1670_v62, %s2154_s10  ;;  %v1409_v11 = vpop.xlane.xlu1 %1408  ;;  %v1432_v14 = vadd.f32 %v1400_v42, %v1330_v23 }
 0x2b7   : > { %v1553_v13 = vpop.xlane.xlu0 %1552 }
 0x2b8   : > { %v1654_v16 = vadd.f32 %v1622_v43, %v1553_v13  ;;  %v1631_v17 = vpop.xlane.xlu1 %1630 }
 0x2ba   : > { %v1671_v15 = vsel %vm1663_vm3, %v1432_v14, %v1654_v16 }
 0x2bb   : > { %v1412_v19 = vpop.xlane.xlu0 %1411  ;;  %1710 = vrot.lane.b32.xlu1 %v1671_v15, %s2154_s10 }
 0x2bc   : > { %v1333_v10 = vpop.xlane.xlu1 %1332 }
 0x2bd   : > { %v1433_v32 = vadd.f32 %v1403_v54, %v1333_v10 }
 0x2bf   : > { %v1634_v20 = vpop.xlane.xlu0 %1633 }
 0x2c0   : > { %v1556_v24 = vpop.xlane.xlu1 %1555 }
 0x2c1   : > { %v1655_v25 = vadd.f32 %v1625_v60, %v1556_v24 }
 0x2c3   : > { %v1336_v27 = vpop.xlane.xlu0 %1335  ;;  %v1672_v29 = vsel %vm1663_vm3, %v1433_v32, %v1655_v25 }
 0x2c4   : > { %1712 = vrot.lane.b32.xlu0 %v1672_v29, %s2154_s10  ;;  %v1415_v8 = vpop.xlane.xlu1 %1414  ;;  %v1434_v9 = vadd.f32 %v1406_v63, %v1336_v27 }
 0x2c7   : > { %v1559_v30 = vpop.xlane.xlu0 %1558 }
 0x2c8   : > { %v1656_v1 = vadd.f32 %v1628_v5, %v1559_v30  ;;  %v1637_v31 = vpop.xlane.xlu1 %1636 }
 0x2ca   : > { %v1673_v35 = vsel %vm1663_vm3, %v1434_v9, %v1656_v1 }
 0x2cb   : > { %v1418_v2 = vpop.xlane.xlu0 %1417  ;;  %1714 = vrot.lane.b32.xlu1 %v1673_v35, %s2154_s10 }
 0x2cc   : > { %v1339_v38 = vpop.xlane.xlu1 %1338 }
 0x2cd   : > { %v1435_v44 = vadd.f32 %v1409_v11, %v1339_v38 }
 0x2cf   : > { %v1640_v39 = vpop.xlane.xlu0 %1639 }
 0x2d0   : > { %v1562_v42 = vpop.xlane.xlu1 %1561 }
 0x2d1   : > { %v1657_v45 = vadd.f32 %v1631_v17, %v1562_v42  ;;  %v1986_v17 = vld [vmem:[%s2910_s8] ss:$0 sm:$0xff] }
 0x2d3   : > { %v1342_v43 = vpop.xlane.xlu0 %1341  ;;  %v1674_v36 = vsel %vm1663_vm3, %v1435_v44, %v1657_v45 }
 0x2d4   : > { %1716 = vrot.lane.b32.xlu0 %v1674_v36, %s2154_s10  ;;  %v1421_v47 = vpop.xlane.xlu1 %1420  ;;  %v1436_v37 = vadd.f32 %v1412_v19, %v1342_v43 }
 0x2d7   : > { %v1565_v49 = vpop.xlane.xlu0 %1564 }
 0x2d8   : > { %v1658_v50 = vadd.f32 %v1634_v20, %v1565_v49  ;;  %v1345_v51 = vpop.xlane.xlu1 %1344 }
 0x2d9   : > { %v1437_v57 = vadd.f32 %v1415_v8, %v1345_v51 }
 0x2da   : > { %v1675_v53 = vsel %vm1663_vm3, %v1436_v37, %v1658_v50 }
 0x2db   : > { %v1424_v54 = vpop.xlane.xlu0 %1423  ;;  %1718 = vrot.lane.b32.xlu1 %v1675_v53, %s2154_s10 }
 0x2dc   : > { %v1568_v56 = vpop.xlane.xlu1 %1567 }
 0x2dd   : > { %v1659_v59 = vadd.f32 %v1637_v31, %v1568_v56 }
 0x2df   : > { %v1348_v60 = vpop.xlane.xlu0 %1347  ;;  %v1676_v61 = vsel %vm1663_vm3, %v1437_v57, %v1659_v59 }
 0x2e0   : > { %1720 = vrot.lane.b32.xlu0 %v1676_v61, %s2154_s10  ;;  %v1351_v63 = vpop.xlane.xlu1 %1350  ;;  %v1438_v5 = vadd.f32 %v1418_v2, %v1348_v60 }
 0x2e1   : > { %v1439_v11 = vadd.f32 %v1421_v47, %v1351_v63 }
 0x2e3   : > { %v1571_v21 = vpop.xlane.xlu0 %1570 }
 0x2e4   : > { %v1660_v6 = vadd.f32 %v1640_v39, %v1571_v21  ;;  %v1574_v3 = vpop.xlane.xlu1 %1573 }
 0x2e6   : > { %v1677_v4 = vsel %vm1663_vm3, %v1438_v5, %v1660_v6 }
 0x2e7   : > { %v1354_v23 = vpop.xlane.xlu0 %1353  ;;  %1722 = vrot.lane.b32.xlu1 %v1677_v4, %s2154_s10 }
 0x2e8   : > { %v1643_v62 = vpop.xlane.xlu1 %1642  ;;  %v1440_v19 = vadd.f32 %v1424_v54, %v1354_v23 }
 0x2e9   : > { %v1661_v13 = vadd.f32 %v1643_v62, %v1574_v3 }
 0x2eb   : > { %v1577_v14 = vpop.xlane.xlu0 %1576  ;;  %v1678_v16 = vsel %vm1663_vm3, %v1439_v11, %v1661_v13 }
 0x2ec   : > { %1724 = vrot.lane.b32.xlu0 %v1678_v16, %s2154_s10 }
 0x2ef   : > { %v1646_v15 = vpop.xlane.xlu0 %1645 }
 0x2f0   : > { %v1662_v10 = vadd.f32 %v1646_v15, %v1577_v14  ;;  %1766 = vrot.lane.b32.xlu0 %v1986_v17, %s2154_s10 }
 0x2f2   : > { %v1679_v20 = vsel %vm1663_vm3, %v1440_v19, %v1662_v10 }
 0x2f3   : > { %1726 = vrot.lane.b32.xlu1 %v1679_v20, %s2154_s10 }
 0x2f6   : > { %v1697_v29 = vpop.permute.xlu1 %1696 }
 0x2f7   : > { %v1744_v35 = vadd.f32 %v1697_v29, %v2435_v22 }
 0x2fa   : > { %v1699_v24 = vpop.permute.xlu0 %1698 }
 0x2fb   : > { %v1745_v2 = vadd.f32 %v1699_v24, %v2440_v28 }
 0x306   : > { %v1701_v30 = vpop.permute.xlu1 %1700 }
 0x307   : > { %v1746_v45 = vadd.f32 %v1701_v30, %v2446_v34 }
 0x30a   : > { %v1703_v31 = vpop.permute.xlu1 %1702 }
 0x30b   : > { %v1747_v43 = vadd.f32 %v1703_v31, %v2452_v40 }
 0x316   : > { %v1705_v32 = vpop.permute.xlu0 %1704 }
 0x317   : > { %v1748_v22 = vadd.f32 %v1705_v32, %v2458_v46 }
 0x31d   : > { %v1707_v44 = vpop.permute.xlu1 %1706 }
 0x31e   : > { %v1749_v28 = vadd.f32 %v1707_v44, %v2464_v52 }
 0x326   : > { %v1709_v25 = vpop.permute.xlu0 %1708 }
 0x327   : > { %v1750_v40 = vadd.f32 %v1709_v25, %v2470_v58 }
 0x32d   : > { %v1711_v49 = vpop.permute.xlu1 %1710 }
 0x32e   : > { %v1751_v51 = vadd.f32 %v1711_v49, %v2476_v0 }
 0x336   : > { %v1713_v27 = vpop.permute.xlu0 %1712 }
 0x337   : > { %v1752_v52 = vadd.f32 %v1713_v27, %v2482_v7 }
 0x33d   : > { %v1715_v50 = vpop.permute.xlu1 %1714 }
 0x33e   : > { %v1753_v56 = vadd.f32 %v1715_v50, %v2488_v12 }
 0x346   : > { %v1717_v8 = vpop.permute.xlu0 %1716 }
 0x347   : > { %v1754_v0 = vadd.f32 %v1717_v8, %v2494_v18 }
 0x34d   : > { %v1719_v46 = vpop.permute.xlu1 %1718 }
 0x34e   : > { %v1755_v60 = vadd.f32 %v1719_v46, %v2500_v26 }
 0x352   : > { %v1721_v9 = vpop.permute.xlu0 %1720 }
 0x353   : > { %v1756_v12 = vadd.f32 %v1721_v9, %v2506_v33 }
 0x359   : > { %v1723_v58 = vpop.permute.xlu1 %1722 }
 0x35a   : > { %v1757_v21 = vadd.f32 %v1723_v58, %v2512_v41 }
 0x35e   : > { %v1725_v1 = vpop.permute.xlu0 %1724 }
 0x35f   : > { %v1758_v6 = vadd.f32 %v1725_v1, %v2518_v48 }
 0x362   : > { %v1767_v38 = vpop.permute.xlu0 %1766 }
 0x363   : > { %v1770_v39 = vadd.f32 %v1767_v38, %v1745_v2  ;;  %v1769_v42 = vadd.f32 %v1767_v38, %v1744_v35  ;;  %v1771_v36 = vadd.f32 %v1767_v38, %v1746_v45  ;;  %v1772_v47 = vadd.f32 %v1767_v38, %v1747_v43 }
 0x364   : > { %v1773_v37 = vadd.f32 %v1767_v38, %v1748_v22  ;;  %v1774_v34 = vadd.f32 %v1767_v38, %v1749_v28  ;;  %v1775_v53 = vadd.f32 %v1767_v38, %v1750_v40  ;;  %v1776_v54 = vadd.f32 %v1767_v38, %v1751_v51 }
 0x365   : > { %1803 = vrot.lane.b32.xlu0 %v1770_v39, %s2155_s13  ;;  %1801 = vrot.lane.b32.xlu1 %v1769_v42, %s2155_s13  ;;  %v1777_v57 = vadd.f32 %v1767_v38, %v1752_v52  ;;  %v1778_v59 = vadd.f32 %v1767_v38, %v1753_v56  ;;  %v1779_v61 = vadd.f32 %v1767_v38, %v1754_v0  ;;  %v1727_v7 = vpop.permute.xlu1 %1726 }
 0x366   : > { %v1780_v63 = vadd.f32 %v1767_v38, %v1755_v60  ;;  %v1759_v18 = vadd.f32 %v1727_v7, %v2524_v55  ;;  %v1781_v5 = vadd.f32 %v1767_v38, %v1756_v12  ;;  %v1782_v26 = vadd.f32 %v1767_v38, %v1757_v21 }
 0x367   : > { %v1783_v4 = vadd.f32 %v1767_v38, %v1758_v6 }
 0x368   : > { %v1784_v3 = vadd.f32 %v1767_v38, %v1759_v18 }
 0x369   : > { %1805 = vrot.lane.b32.xlu1 %v1771_v36, %s2155_s13  ;;  %1807 = vrot.lane.b32.xlu0 %v1772_v47, %s2155_s13 }
 0x36d   : > { %1809 = vrot.lane.b32.xlu1 %v1773_v37, %s2155_s13  ;;  %1811 = vrot.lane.b32.xlu0 %v1774_v34, %s2155_s13 }
 0x371   : > { %1813 = vrot.lane.b32.xlu1 %v1775_v53, %s2155_s13  ;;  %1815 = vrot.lane.b32.xlu0 %v1776_v54, %s2155_s13 }
 0x375   : > { %1817 = vrot.lane.b32.xlu1 %v1777_v57, %s2155_s13  ;;  %1819 = vrot.lane.b32.xlu0 %v1778_v59, %s2155_s13 }
 0x379   : > { %1821 = vrot.lane.b32.xlu1 %v1779_v61, %s2155_s13  ;;  %1823 = vrot.lane.b32.xlu0 %v1780_v63, %s2155_s13 }
 0x37d   : > { %1825 = vrot.lane.b32.xlu1 %v1781_v5, %s2155_s13  ;;  %1827 = vrot.lane.b32.xlu0 %v1782_v26, %s2155_s13 }
 0x381   : > { %1829 = vrot.lane.b32.xlu1 %v1783_v4, %s2155_s13  ;;  %1831 = vrot.lane.b32.xlu0 %v1784_v3, %s2155_s13 }
 0x3d7   : > { %v1804_v33 = vpop.permute.xlu0 %1803  ;;  %v1802_v41 = vpop.permute.xlu1 %1801 }
 0x3d8   : > { %1851 = vst.msk [vmem:[%s2865_s18 + $0x8] sm:$0xff] %vm1849_vm4, %v1804_v33  ;;  %1850 = vst.msk [vmem:[%s2865_s18] sm:$0xff] %vm1849_vm4, %v1802_v41 }
 0x3db   : > { %v1808_v48 = vpop.permute.xlu0 %1807  ;;  %v1806_v55 = vpop.permute.xlu1 %1805 }
 0x3dc   : > { %1853 = vst.msk [vmem:[%s2865_s18 + $0x18] sm:$0xff] %vm1849_vm4, %v1808_v48  ;;  %1852 = vst.msk [vmem:[%s2865_s18 + $0x10] sm:$0xff] %vm1849_vm4, %v1806_v55 }
 0x3df   : > { %v1812_v23 = vpop.permute.xlu0 %1811  ;;  %v1810_v62 = vpop.permute.xlu1 %1809 }
 0x3e0   : > { %1855 = vst.msk [vmem:[%s2865_s18 + $0x28] sm:$0xff] %vm1849_vm4, %v1812_v23  ;;  %1854 = vst.msk [vmem:[%s2865_s18 + $0x20] sm:$0xff] %vm1849_vm4, %v1810_v62 }
 0x3e3   : > { %v1816_v11 = vpop.permute.xlu0 %1815  ;;  %v1814_v13 = vpop.permute.xlu1 %1813 }
 0x3e4   : > { %1857 = vst.msk [vmem:[%s2865_s18 + $0x38] sm:$0xff] %vm1849_vm4, %v1816_v11  ;;  %1856 = vst.msk [vmem:[%s2865_s18 + $0x30] sm:$0xff] %vm1849_vm4, %v1814_v13 }
 0x3e7   : > { %v1820_v14 = vpop.permute.xlu0 %1819  ;;  %v1818_v16 = vpop.permute.xlu1 %1817 }
 0x3e8   : > { %1859 = vst.msk [vmem:[%s2865_s18 + $0x48] sm:$0xff] %vm1849_vm4, %v1820_v14  ;;  %1858 = vst.msk [vmem:[%s2865_s18 + $0x40] sm:$0xff] %vm1849_vm4, %v1818_v16 }
 0x3eb   : > { %v1824_v17 = vpop.permute.xlu0 %1823  ;;  %v1822_v15 = vpop.permute.xlu1 %1821 }
 0x3ec   : > { %1861 = vst.msk [vmem:[%s2865_s18 + $0x58] sm:$0xff] %vm1849_vm4, %v1824_v17  ;;  %1860 = vst.msk [vmem:[%s2865_s18 + $0x50] sm:$0xff] %vm1849_vm4, %v1822_v15 }
 0x3ef   : > { %v1828_v19 = vpop.permute.xlu0 %1827  ;;  %v1826_v10 = vpop.permute.xlu1 %1825 }
 0x3f0   : > { %1863 = vst.msk [vmem:[%s2865_s18 + $0x68] sm:$0xff] %vm1849_vm4, %v1828_v19  ;;  %1862 = vst.msk [vmem:[%s2865_s18 + $0x60] sm:$0xff] %vm1849_vm4, %v1826_v10 }
 0x3f3   : > { %v1832_v20 = vpop.permute.xlu0 %1831  ;;  %v1830_v24 = vpop.permute.xlu1 %1829 }
 0x3f4   : > { %1865 = vst.msk [vmem:[%s2865_s18 + $0x78] sm:$0xff] %vm1849_vm4, %v1832_v20  ;;  %1864 = vst.msk [vmem:[%s2865_s18 + $0x70] sm:$0xff] %vm1849_vm4, %v1830_v24 }
 0x3f5 PF: > { %s19_s30 = sadd.s32 1, %s2150_s30  }
 0x3f6   : > { %p16_p4 = scmp.ge.s32.totalorder %s19_s30, 4  }
 0x3f8   :  { %18 = sbr.rel (!%p16_p4) target bundleno = 1 (0x1), region = 86 }

</bundles_post_ra>
